<compile_context>
chip_gen: v5e
topology: v5e:2x2
jax: 0.10.0
libtpu: 0.0.40
codegen_flags: <defaults>
</compile_context>

<pallas_src>
import functools

import jax
import jax.numpy as jnp
from jax import lax
from jax.experimental import pallas as pl
from jax.experimental.pallas import tpu as pltpu


# MXU operand dtype.  Set to jnp.float32 to disable mixed precision.
MXU_DTYPE = jnp.bfloat16


# ----------------------------- in-kernel helpers -----------------------------

def _layernorm(x, gamma, beta, eps=1e-5):
    # x: (N, D) f32; gamma/beta: (1, D) f32 — statistics kept in f32.
    mean = jnp.mean(x, axis=-1, keepdims=True)
    var = jnp.mean((x - mean) ** 2, axis=-1, keepdims=True)
    return (x - mean) * lax.rsqrt(var + eps) * gamma + beta


def _mm(a, b, mxu_dtype):
    # bf16 MXU operands, f32 accumulation.
    return jnp.dot(a.astype(mxu_dtype), b.astype(mxu_dtype),
                   preferred_element_type=jnp.float32)


def _mha(qx, kx, vx, wq, wk, wv, wo, bo, *, heads, dim_head, mxu_dtype):
    """Multi-head attention for one batch element.

    qx/kx/vx: (N, D) f32, already LayerNormed where the module requires it.
    Returns (N, D) f32 = to_out(softmax(q k^T * scale) v).
    Per-head results are accumulated into the output projection (no concat).
    """
    scale = dim_head ** -0.5
    # Fused q/k/v projections over all heads (one MXU pass each); scale q
    # (N x inner) instead of every (N, N) score matrix.
    q = (_mm(qx, wq, mxu_dtype) * scale).astype(mxu_dtype)
    k = _mm(kx, wk, mxu_dtype).astype(mxu_dtype)
    v = _mm(vx, wv, mxu_dtype).astype(mxu_dtype)

    acc = None
    for h in range(heads):                                   # static, unrolled
        sl = slice(h * dim_head, (h + 1) * dim_head)
        qh, kh, vh = q[:, sl], k[:, sl], v[:, sl]            # (N, dh)
        s = lax.dot_general(qh, kh, (((1,), (1,)), ((), ())),
                            preferred_element_type=jnp.float32)   # q kT -> (N, N)
        s = s - jnp.max(s, axis=-1, keepdims=True)
        e = jnp.exp(s)
        p = e * pl.reciprocal(jnp.sum(e, axis=-1, keepdims=True), approx=True)
        ctx = jnp.dot(p.astype(mxu_dtype), vh,
                      preferred_element_type=jnp.float32)         # (N, dh)
        part = _mm(ctx, wo[sl, :], mxu_dtype)                     # (N, D)
        acc = part if acc is None else acc + part
    return acc + bo                                               # bias once


# ------------------------------- fused kernel --------------------------------

def transformer_kernel(
    # sequence inputs
    x_ref, y_ref, z_ref,
    # per-layer self-attention (attn_1) params
    a1_lng_ref, a1_lnb_ref, a1_wq_ref, a1_wk_ref, a1_wv_ref, a1_wo_ref, a1_bo_ref,
    # per-layer cross-attention (attn_2) params
    a2_lng_ref, a2_lnb_ref, a2_wq_ref, a2_wk_ref, a2_wv_ref, a2_wo_ref, a2_bo_ref,
    # per-layer feed-forward params
    ff_lng_ref, ff_lnb_ref, ff_w1_ref, ff_b1_ref, ff_w2_ref, ff_b2_ref,
    # final LayerNorm params
    fin_g_ref, fin_b_ref,
    # output
    o_ref,
    # scratch: running activation, resident in VMEM across the depth axis
    x_state,
    *, heads, dim_head, mxu_dtype):

    layer = pl.program_id(1)
    n_layers = pl.num_programs(1)

    @pl.when(layer == 0)
    def _init():
        x_state[...] = x_ref[0]

    x = x_state[...]          # (N, D) f32
    y = y_ref[0]              # (N, D)
    z = z_ref[0]              # (N, D)

    # --- attn_1: x = attn(x, x, x) + x ; x==y==z -> LayerNorm computed once ---
    xn = _layernorm(x, a1_lng_ref[0], a1_lnb_ref[0])
    x = x + _mha(xn, xn, xn,
                 a1_wq_ref[0], a1_wk_ref[0], a1_wv_ref[0], a1_wo_ref[0],
                 a1_bo_ref[0], heads=heads, dim_head=dim_head, mxu_dtype=mxu_dtype)

    # --- attn_2: x = attn(x, y, z) + x ; x!=y -> only x, y normalized; z raw ---
    xn2 = _layernorm(x, a2_lng_ref[0], a2_lnb_ref[0])
    yn2 = _layernorm(y, a2_lng_ref[0], a2_lnb_ref[0])
    x = x + _mha(xn2, yn2, z,
                 a2_wq_ref[0], a2_wk_ref[0], a2_wv_ref[0], a2_wo_ref[0],
                 a2_bo_ref[0], heads=heads, dim_head=dim_head, mxu_dtype=mxu_dtype)

    # --- feed-forward: x = Linear(GELU(Linear(LN(x)))) + x ---
    hn = _layernorm(x, ff_lng_ref[0], ff_lnb_ref[0])
    h = _mm(hn, ff_w1_ref[0], mxu_dtype) + ff_b1_ref[0]
    h = 0.5 * h * (1.0 + lax.erf(h * 0.7071067811865476))   # exact GELU (erf)
    x = x + _mm(h, ff_w2_ref[0], mxu_dtype) + ff_b2_ref[0]

    x_state[...] = x

    @pl.when(layer == n_layers - 1)
    def _final():
        xf = _layernorm(x, fin_g_ref[...], fin_b_ref[...])
        o_ref[0] = 1.0 / (1.0 + jnp.exp(-xf))    # exact sigmoid (once per batch)


# ------------------------------ pallas_call glue ------------------------------

_LAYER_PARAM_ORDER = (
    "a1_lng", "a1_lnb", "a1_wq", "a1_wk", "a1_wv", "a1_wo", "a1_bo",
    "a2_lng", "a2_lnb", "a2_wq", "a2_wk", "a2_wv", "a2_wo", "a2_bo",
    "ff_lng", "ff_lnb", "ff_w1", "ff_b1", "ff_w2", "ff_b2",
)


def transformer_forward(x, y, z, params, *, heads, dim_head):
    """Matches Transformer.forward: depth x (self-attn + cross-attn + FFN),
    then sigmoid(LayerNorm(x)).  Single fused pallas_call."""
    B, N, D = x.shape
    depth = params["a1_wq"].shape[0]

    seq_spec = pl.BlockSpec((1, N, D), lambda b, l: (b, 0, 0))

    def layer_spec(arr):           # stacked per-layer param, indexed by depth l
        zeros = (0,) * (arr.ndim - 1)
        return pl.BlockSpec((1,) + arr.shape[1:], lambda b, l, zz=zeros: (l,) + zz)

    def fixed_spec(arr):           # whole array, every grid step
        zeros = (0,) * arr.ndim
        return pl.BlockSpec(arr.shape, lambda b, l, zz=zeros: zz)

    layer_args = [params[name] for name in _LAYER_PARAM_ORDER]
    fin_g, fin_b = params["fin_g"], params["fin_b"]

    kernel = functools.partial(transformer_kernel, heads=heads,
                               dim_head=dim_head, mxu_dtype=MXU_DTYPE)

    return pl.pallas_call(
        kernel,
        out_shape=jax.ShapeDtypeStruct((B, N, D), jnp.float32),
        grid=(B, depth),
        in_specs=([seq_spec, seq_spec, seq_spec]
                  + [layer_spec(a) for a in layer_args]
                  + [fixed_spec(fin_g), fixed_spec(fin_b)]),
        out_specs=seq_spec,
        scratch_shapes=[pltpu.VMEM((N, D), jnp.float32)],
        compiler_params=pltpu.CompilerParams(
            dimension_semantics=("parallel", "arbitrary")),
    )(x, y, z, *layer_args, fin_g, fin_b)


# ----------------------------- parameter creation -----------------------------

def init_params(key, dim, depth, heads, dim_head, mlp_dim):
    inner = heads * dim_head
    ks = jax.random.split(key, 14)

    def w(k, shape, scale=0.05, dtype=MXU_DTYPE):
        return (scale * jax.random.normal(k, shape, dtype=jnp.float32)).astype(dtype)

    ones = lambda s: jnp.ones(s, jnp.float32)
    zeros = lambda s: jnp.zeros(s, jnp.float32)

    return {
        # attn_1 (self-attention)
        "a1_lng": ones((depth, 1, dim)), "a1_lnb": zeros((depth, 1, dim)),
        "a1_wq": w(ks[0], (depth, dim, inner)),
        "a1_wk": w(ks[1], (depth, dim, inner)),
        "a1_wv": w(ks[2], (depth, dim, inner)),
        "a1_wo": w(ks[3], (depth, inner, dim)),
        "a1_bo": w(ks[4], (depth, 1, dim), dtype=jnp.float32),
        # attn_2 (cross-attention)
        "a2_lng": ones((depth, 1, dim)), "a2_lnb": zeros((depth, 1, dim)),
        "a2_wq": w(ks[5], (depth, dim, inner)),
        "a2_wk": w(ks[6], (depth, dim, inner)),
        "a2_wv": w(ks[7], (depth, dim, inner)),
        "a2_wo": w(ks[8], (depth, inner, dim)),
        "a2_bo": w(ks[9], (depth, 1, dim), dtype=jnp.float32),
        # feed-forward
        "ff_lng": ones((depth, 1, dim)), "ff_lnb": zeros((depth, 1, dim)),
        "ff_w1": w(ks[10], (depth, dim, mlp_dim)),
        "ff_b1": w(ks[11], (depth, 1, mlp_dim), dtype=jnp.float32),
        "ff_w2": w(ks[12], (depth, mlp_dim, dim)),
        "ff_b2": w(ks[13], (depth, 1, dim), dtype=jnp.float32),
        # final LayerNorm
        "fin_g": ones((1, dim)), "fin_b": zeros((1, dim)),
    }


# ------------------------------------ main ------------------------------------

if __name__ == "__main__":
    # Small but representative configuration.
    B, N = 2, 8
    dim, depth, heads, dim_head, mlp_dim = 32, 2, 4, 16, 64

    root = jax.random.PRNGKey(0)
    kx, ky, kz, kp = jax.random.split(root, 4)
    x = jax.random.normal(kx, (B, N, dim), dtype=jnp.float32)
    y = jax.random.normal(ky, (B, N, dim), dtype=jnp.float32)
    z = jax.random.normal(kz, (B, N, dim), dtype=jnp.float32)

    params = init_params(kp, dim, depth, heads, dim_head, mlp_dim)

    fwd = jax.jit(functools.partial(transformer_forward,
                                    heads=heads, dim_head=dim_head))
    out = jax.block_until_ready(fwd(x, y, z, params))

    assert out.shape == (B, N, dim)
    assert bool(jnp.all(jnp.isfinite(out)))
    assert bool(jnp.all((out > 0.0) & (out < 1.0)))   # post-sigmoid range

    print("KERNEL_OK")
</pallas_src>

<mosaic_0001>
module attributes {stable_mosaic.version = 11 : i64} {
  func.func @transformer_kernel(%arg0: i32, %arg1: i32, %arg2: memref<1x8x32xf32, #tpu.memory_space<vmem>>, %arg3: memref<1x8x32xf32, #tpu.memory_space<vmem>>, %arg4: memref<1x8x32xf32, #tpu.memory_space<vmem>>, %arg5: memref<1x1x32xf32, #tpu.memory_space<vmem>>, %arg6: memref<1x1x32xf32, #tpu.memory_space<vmem>>, %arg7: memref<1x32x64xbf16, #tpu.memory_space<vmem>>, %arg8: memref<1x32x64xbf16, #tpu.memory_space<vmem>>, %arg9: memref<1x32x64xbf16, #tpu.memory_space<vmem>>, %arg10: memref<1x64x32xbf16, #tpu.memory_space<vmem>>, %arg11: memref<1x1x32xf32, #tpu.memory_space<vmem>>, %arg12: memref<1x1x32xf32, #tpu.memory_space<vmem>>, %arg13: memref<1x1x32xf32, #tpu.memory_space<vmem>>, %arg14: memref<1x32x64xbf16, #tpu.memory_space<vmem>>, %arg15: memref<1x32x64xbf16, #tpu.memory_space<vmem>>, %arg16: memref<1x32x64xbf16, #tpu.memory_space<vmem>>, %arg17: memref<1x64x32xbf16, #tpu.memory_space<vmem>>, %arg18: memref<1x1x32xf32, #tpu.memory_space<vmem>>, %arg19: memref<1x1x32xf32, #tpu.memory_space<vmem>>, %arg20: memref<1x1x32xf32, #tpu.memory_space<vmem>>, %arg21: memref<1x32x64xbf16, #tpu.memory_space<vmem>>, %arg22: memref<1x1x64xf32, #tpu.memory_space<vmem>>, %arg23: memref<1x64x32xbf16, #tpu.memory_space<vmem>>, %arg24: memref<1x1x32xf32, #tpu.memory_space<vmem>>, %arg25: memref<1x32xf32, #tpu.memory_space<vmem>>, %arg26: memref<1x32xf32, #tpu.memory_space<vmem>>, %arg27: memref<1x8x32xf32, #tpu.memory_space<vmem>>, %arg28: memref<8x32xf32, #tpu.memory_space<vmem>>) attributes {dimension_semantics = [#tpu.dimension_semantics<parallel>, #tpu.dimension_semantics<arbitrary>], iteration_bounds = array<i64: 2, 2>, scalar_prefetch = 0 : i64, scratch_operands = 1 : i64, tpu.core_type = #tpu.core_type<tc>, window_params = [{transform_indices = @transform_0, window_bounds = array<i64: 1, 8, 32>}, {transform_indices = @transform_1, window_bounds = array<i64: 1, 8, 32>}, {transform_indices = @transform_2, window_bounds = array<i64: 1, 8, 32>}, {transform_indices = @transform_3, window_bounds = array<i64: 1, 1, 32>}, {transform_indices = @transform_4, window_bounds = array<i64: 1, 1, 32>}, {transform_indices = @transform_5, window_bounds = array<i64: 1, 32, 64>}, {transform_indices = @transform_6, window_bounds = array<i64: 1, 32, 64>}, {transform_indices = @transform_7, window_bounds = array<i64: 1, 32, 64>}, {transform_indices = @transform_8, window_bounds = array<i64: 1, 64, 32>}, {transform_indices = @transform_9, window_bounds = array<i64: 1, 1, 32>}, {transform_indices = @transform_10, window_bounds = array<i64: 1, 1, 32>}, {transform_indices = @transform_11, window_bounds = array<i64: 1, 1, 32>}, {transform_indices = @transform_12, window_bounds = array<i64: 1, 32, 64>}, {transform_indices = @transform_13, window_bounds = array<i64: 1, 32, 64>}, {transform_indices = @transform_14, window_bounds = array<i64: 1, 32, 64>}, {transform_indices = @transform_15, window_bounds = array<i64: 1, 64, 32>}, {transform_indices = @transform_16, window_bounds = array<i64: 1, 1, 32>}, {transform_indices = @transform_17, window_bounds = array<i64: 1, 1, 32>}, {transform_indices = @transform_18, window_bounds = array<i64: 1, 1, 32>}, {transform_indices = @transform_19, window_bounds = array<i64: 1, 32, 64>}, {transform_indices = @transform_20, window_bounds = array<i64: 1, 1, 64>}, {transform_indices = @transform_21, window_bounds = array<i64: 1, 64, 32>}, {transform_indices = @transform_22, window_bounds = array<i64: 1, 1, 32>}, {pipeline_mode = #tpu.pipeline_mode<synchronous>, transform_indices = @transform_23, window_bounds = array<i64: 1, 32>}, {pipeline_mode = #tpu.pipeline_mode<synchronous>, transform_indices = @transform_24, window_bounds = array<i64: 1, 32>}, {transform_indices = @transform_25, window_bounds = array<i64: 1, 8, 32>}]} {
    %c0_i32 = arith.constant 0 : i32
    %0 = arith.cmpi eq, %arg1, %c0_i32 : i32
    %1 = arith.extui %0 : i1 to i32
    %c0_i32_0 = arith.constant 0 : i32
    %2 = arith.cmpi ne, %1, %c0_i32_0 : i32
    scf.if %2 {
      %c0_149 = arith.constant 0 : index
      %c0_150 = arith.constant 0 : index
      %c0_151 = arith.constant 0 : index
      %347 = vector.load %arg2[%c0_149, %c0_150, %c0_151] : memref<1x8x32xf32, #tpu.memory_space<vmem>>, vector<1x8x32xf32>
      %348 = vector.shape_cast %347 : vector<1x8x32xf32> to vector<8x32xf32>
      %c0_152 = arith.constant 0 : index
      %c0_153 = arith.constant 0 : index
      %349 = vector.load %arg28[%c0_152, %c0_153] : memref<8x32xf32, #tpu.memory_space<vmem>>, vector<8x32xf32>
      tpu.vector_store %arg28[%c0_152, %c0_153], %348 {strides = array<i32>} : memref<8x32xf32, #tpu.memory_space<vmem>>, vector<8x32xf32>,
    } else {
    }
    %c0 = arith.constant 0 : index
    %c0_1 = arith.constant 0 : index
    %3 = vector.load %arg28[%c0, %c0_1] : memref<8x32xf32, #tpu.memory_space<vmem>>, vector<8x32xf32>
    %c0_2 = arith.constant 0 : index
    %c0_3 = arith.constant 0 : index
    %c0_4 = arith.constant 0 : index
    %4 = vector.load %arg3[%c0_2, %c0_3, %c0_4] : memref<1x8x32xf32, #tpu.memory_space<vmem>>, vector<1x8x32xf32>
    %5 = vector.shape_cast %4 : vector<1x8x32xf32> to vector<8x32xf32>
    %c0_5 = arith.constant 0 : index
    %c0_6 = arith.constant 0 : index
    %c0_7 = arith.constant 0 : index
    %6 = vector.load %arg4[%c0_5, %c0_6, %c0_7] : memref<1x8x32xf32, #tpu.memory_space<vmem>>, vector<1x8x32xf32>
    %7 = vector.shape_cast %6 : vector<1x8x32xf32> to vector<8x32xf32>
    %c0_8 = arith.constant 0 : index
    %c0_9 = arith.constant 0 : index
    %c0_10 = arith.constant 0 : index
    %8 = vector.load %arg5[%c0_8, %c0_9, %c0_10] : memref<1x1x32xf32, #tpu.memory_space<vmem>>, vector<1x1x32xf32>
    %9 = vector.shape_cast %8 : vector<1x1x32xf32> to vector<1x32xf32>
    %c0_11 = arith.constant 0 : index
    %c0_12 = arith.constant 0 : index
    %c0_13 = arith.constant 0 : index
    %10 = vector.load %arg6[%c0_11, %c0_12, %c0_13] : memref<1x1x32xf32, #tpu.memory_space<vmem>>, vector<1x1x32xf32>
    %11 = vector.shape_cast %10 : vector<1x1x32xf32> to vector<1x32xf32>
    %cst = arith.constant dense<0.000000e+00> : vector<8xf32>
    %12 = vector.multi_reduction <add>, %3, %cst [1] : vector<8x32xf32> to vector<8xf32>
    %13 = vector.shape_cast %12 : vector<8xf32> to vector<8x1xf32>
    %cst_14 = arith.constant 3.200000e+01 : f32
    %14 = vector.broadcast %cst_14 : f32 to vector<8x1xf32>
    %15 = arith.divf %13, %14 : vector<8x1xf32>
    %16 = vector.broadcast %15 : vector<8x1xf32> to vector<8x32xf32>
    %17 = arith.subf %3, %16 : vector<8x32xf32>
    %18 = arith.mulf %17, %17 : vector<8x32xf32>
    %cst_15 = arith.constant dense<0.000000e+00> : vector<8xf32>
    %19 = vector.multi_reduction <add>, %18, %cst_15 [1] : vector<8x32xf32> to vector<8xf32>
    %20 = vector.shape_cast %19 : vector<8xf32> to vector<8x1xf32>
    %cst_16 = arith.constant 3.200000e+01 : f32
    %21 = vector.broadcast %cst_16 : f32 to vector<8x1xf32>
    %22 = arith.divf %20, %21 : vector<8x1xf32>
    %23 = vector.broadcast %15 : vector<8x1xf32> to vector<8x32xf32>
    %24 = arith.subf %3, %23 : vector<8x32xf32>
    %cst_17 = arith.constant 9.99999974E-6 : f32
    %25 = vector.broadcast %cst_17 : f32 to vector<8x1xf32>
    %26 = arith.addf %22, %25 : vector<8x1xf32>
    %27 = math.rsqrt %26 : vector<8x1xf32>
    %28 = vector.broadcast %27 : vector<8x1xf32> to vector<8x32xf32>
    %29 = arith.mulf %24, %28 : vector<8x32xf32>
    %30 = vector.broadcast %9 : vector<1x32xf32> to vector<8x32xf32>
    %31 = arith.mulf %29, %30 : vector<8x32xf32>
    %32 = vector.broadcast %11 : vector<1x32xf32> to vector<8x32xf32>
    %33 = arith.addf %31, %32 : vector<8x32xf32>
    %c0_18 = arith.constant 0 : index
    %c0_19 = arith.constant 0 : index
    %c0_20 = arith.constant 0 : index
    %34 = vector.load %arg7[%c0_18, %c0_19, %c0_20] : memref<1x32x64xbf16, #tpu.memory_space<vmem>>, vector<1x32x64xbf16>
    %35 = vector.shape_cast %34 : vector<1x32x64xbf16> to vector<32x64xbf16>
    %c0_21 = arith.constant 0 : index
    %c0_22 = arith.constant 0 : index
    %c0_23 = arith.constant 0 : index
    %36 = vector.load %arg8[%c0_21, %c0_22, %c0_23] : memref<1x32x64xbf16, #tpu.memory_space<vmem>>, vector<1x32x64xbf16>
    %37 = vector.shape_cast %36 : vector<1x32x64xbf16> to vector<32x64xbf16>
    %c0_24 = arith.constant 0 : index
    %c0_25 = arith.constant 0 : index
    %c0_26 = arith.constant 0 : index
    %38 = vector.load %arg9[%c0_24, %c0_25, %c0_26] : memref<1x32x64xbf16, #tpu.memory_space<vmem>>, vector<1x32x64xbf16>
    %39 = vector.shape_cast %38 : vector<1x32x64xbf16> to vector<32x64xbf16>
    %c0_27 = arith.constant 0 : index
    %c0_28 = arith.constant 0 : index
    %c0_29 = arith.constant 0 : index
    %40 = vector.load %arg10[%c0_27, %c0_28, %c0_29] : memref<1x64x32xbf16, #tpu.memory_space<vmem>>, vector<1x64x32xbf16>
    %41 = vector.shape_cast %40 : vector<1x64x32xbf16> to vector<64x32xbf16>
    %c0_30 = arith.constant 0 : index
    %c0_31 = arith.constant 0 : index
    %c0_32 = arith.constant 0 : index
    %42 = vector.load %arg11[%c0_30, %c0_31, %c0_32] : memref<1x1x32xf32, #tpu.memory_space<vmem>>, vector<1x1x32xf32>
    %43 = vector.shape_cast %42 : vector<1x1x32xf32> to vector<1x32xf32>
    %44 = arith.truncf %33 : vector<8x32xf32> to vector<8x32xbf16>
    %cst_33 = arith.constant dense<0.000000e+00> : vector<8x64xf32>
    %45 = tpu.matmul %44, %35, %cst_33 {dimension_numbers = #tpu.dot_dimension_numbers<[1], [0], [0], [1], [0, 0, 1, 1], [], []>} : vector<8x32xbf16>, vector<32x64xbf16>, vector<8x64xf32> -> vector<8x64xf32>
    %cst_34 = arith.constant 2.500000e-01 : f32
    %46 = vector.broadcast %cst_34 : f32 to vector<8x64xf32>
    %47 = arith.mulf %45, %46 : vector<8x64xf32>
    %48 = arith.truncf %47 : vector<8x64xf32> to vector<8x64xbf16>
    %49 = arith.truncf %33 : vector<8x32xf32> to vector<8x32xbf16>
    %cst_35 = arith.constant dense<0.000000e+00> : vector<8x64xf32>
    %50 = tpu.matmul %49, %37, %cst_35 {dimension_numbers = #tpu.dot_dimension_numbers<[1], [0], [0], [1], [0, 0, 1, 1], [], []>} : vector<8x32xbf16>, vector<32x64xbf16>, vector<8x64xf32> -> vector<8x64xf32>
    %51 = arith.truncf %50 : vector<8x64xf32> to vector<8x64xbf16>
    %52 = arith.truncf %33 : vector<8x32xf32> to vector<8x32xbf16>
    %cst_36 = arith.constant dense<0.000000e+00> : vector<8x64xf32>
    %53 = tpu.matmul %52, %39, %cst_36 {dimension_numbers = #tpu.dot_dimension_numbers<[1], [0], [0], [1], [0, 0, 1, 1], [], []>} : vector<8x32xbf16>, vector<32x64xbf16>, vector<8x64xf32> -> vector<8x64xf32>
    %54 = arith.truncf %53 : vector<8x64xf32> to vector<8x64xbf16>
    %55 = vector.extract_strided_slice %48 {offsets = [0, 0], sizes = [8, 16], strides = [1, 1]} : vector<8x64xbf16> to vector<8x16xbf16>
    %56 = vector.extract_strided_slice %51 {offsets = [0, 0], sizes = [8, 16], strides = [1, 1]} : vector<8x64xbf16> to vector<8x16xbf16>
    %57 = vector.extract_strided_slice %54 {offsets = [0, 0], sizes = [8, 16], strides = [1, 1]} : vector<8x64xbf16> to vector<8x16xbf16>
    %cst_37 = arith.constant dense<0.000000e+00> : vector<8x8xf32>
    %58 = tpu.matmul %55, %56, %cst_37 {dimension_numbers = #tpu.dot_dimension_numbers<[1], [1], [0], [0], [0, 0, 1, 0], [], []>} : vector<8x16xbf16>, vector<8x16xbf16>, vector<8x8xf32> -> vector<8x8xf32>
    %cst_38 = arith.constant dense<0xFF800000> : vector<8xf32>
    %59 = vector.multi_reduction <maximumf>, %58, %cst_38 [1] : vector<8x8xf32> to vector<8xf32>
    %60 = vector.shape_cast %59 : vector<8xf32> to vector<8x1xf32>
    %61 = vector.broadcast %60 : vector<8x1xf32> to vector<8x8xf32>
    %62 = arith.subf %58, %61 : vector<8x8xf32>
    %63 = math.exp %62 : vector<8x8xf32>
    %cst_39 = arith.constant dense<0.000000e+00> : vector<8xf32>
    %64 = vector.multi_reduction <add>, %63, %cst_39 [1] : vector<8x8xf32> to vector<8xf32>
    %65 = vector.shape_cast %64 : vector<8xf32> to vector<8x1xf32>
    %66 = tpu.reciprocal %65 {approx = true} : vector<8x1xf32> -> vector<8x1xf32>
    %67 = vector.broadcast %66 : vector<8x1xf32> to vector<8x8xf32>
    %68 = arith.mulf %63, %67 : vector<8x8xf32>
    %69 = arith.truncf %68 : vector<8x8xf32> to vector<8x8xbf16>
    %cst_40 = arith.constant dense<0.000000e+00> : vector<8x16xf32>
    %70 = tpu.matmul %69, %57, %cst_40 {dimension_numbers = #tpu.dot_dimension_numbers<[1], [0], [0], [1], [0, 0, 1, 1], [], []>} : vector<8x8xbf16>, vector<8x16xbf16>, vector<8x16xf32> -> vector<8x16xf32>
    %71 = vector.extract_strided_slice %41 {offsets = [0, 0], sizes = [16, 32], strides = [1, 1]} : vector<64x32xbf16> to vector<16x32xbf16>
    %72 = arith.truncf %70 : vector<8x16xf32> to vector<8x16xbf16>
    %cst_41 = arith.constant dense<0.000000e+00> : vector<8x32xf32>
    %73 = tpu.matmul %72, %71, %cst_41 {dimension_numbers = #tpu.dot_dimension_numbers<[1], [0], [0], [1], [0, 0, 1, 1], [], []>} : vector<8x16xbf16>, vector<16x32xbf16>, vector<8x32xf32> -> vector<8x32xf32>
    %74 = vector.extract_strided_slice %48 {offsets = [0, 16], sizes = [8, 16], strides = [1, 1]} : vector<8x64xbf16> to vector<8x16xbf16>
    %75 = vector.extract_strided_slice %51 {offsets = [0, 16], sizes = [8, 16], strides = [1, 1]} : vector<8x64xbf16> to vector<8x16xbf16>
    %76 = vector.extract_strided_slice %54 {offsets = [0, 16], sizes = [8, 16], strides = [1, 1]} : vector<8x64xbf16> to vector<8x16xbf16>
    %cst_42 = arith.constant dense<0.000000e+00> : vector<8x8xf32>
    %77 = tpu.matmul %74, %75, %cst_42 {dimension_numbers = #tpu.dot_dimension_numbers<[1], [1], [0], [0], [0, 0, 1, 0], [], []>} : vector<8x16xbf16>, vector<8x16xbf16>, vector<8x8xf32> -> vector<8x8xf32>
    %cst_43 = arith.constant dense<0xFF800000> : vector<8xf32>
    %78 = vector.multi_reduction <maximumf>, %77, %cst_43 [1] : vector<8x8xf32> to vector<8xf32>
    %79 = vector.shape_cast %78 : vector<8xf32> to vector<8x1xf32>
    %80 = vector.broadcast %79 : vector<8x1xf32> to vector<8x8xf32>
    %81 = arith.subf %77, %80 : vector<8x8xf32>
    %82 = math.exp %81 : vector<8x8xf32>
    %cst_44 = arith.constant dense<0.000000e+00> : vector<8xf32>
    %83 = vector.multi_reduction <add>, %82, %cst_44 [1] : vector<8x8xf32> to vector<8xf32>
    %84 = vector.shape_cast %83 : vector<8xf32> to vector<8x1xf32>
    %85 = tpu.reciprocal %84 {approx = true} : vector<8x1xf32> -> vector<8x1xf32>
    %86 = vector.broadcast %85 : vector<8x1xf32> to vector<8x8xf32>
    %87 = arith.mulf %82, %86 : vector<8x8xf32>
    %88 = arith.truncf %87 : vector<8x8xf32> to vector<8x8xbf16>
    %cst_45 = arith.constant dense<0.000000e+00> : vector<8x16xf32>
    %89 = tpu.matmul %88, %76, %cst_45 {dimension_numbers = #tpu.dot_dimension_numbers<[1], [0], [0], [1], [0, 0, 1, 1], [], []>} : vector<8x8xbf16>, vector<8x16xbf16>, vector<8x16xf32> -> vector<8x16xf32>
    %90 = vector.extract_strided_slice %41 {offsets = [16, 0], sizes = [16, 32], strides = [1, 1]} : vector<64x32xbf16> to vector<16x32xbf16>
    %91 = arith.truncf %89 : vector<8x16xf32> to vector<8x16xbf16>
    %cst_46 = arith.constant dense<0.000000e+00> : vector<8x32xf32>
    %92 = tpu.matmul %91, %90, %cst_46 {dimension_numbers = #tpu.dot_dimension_numbers<[1], [0], [0], [1], [0, 0, 1, 1], [], []>} : vector<8x16xbf16>, vector<16x32xbf16>, vector<8x32xf32> -> vector<8x32xf32>
    %93 = arith.addf %73, %92 : vector<8x32xf32>
    %94 = vector.extract_strided_slice %48 {offsets = [0, 32], sizes = [8, 16], strides = [1, 1]} : vector<8x64xbf16> to vector<8x16xbf16>
    %95 = vector.extract_strided_slice %51 {offsets = [0, 32], sizes = [8, 16], strides = [1, 1]} : vector<8x64xbf16> to vector<8x16xbf16>
    %96 = vector.extract_strided_slice %54 {offsets = [0, 32], sizes = [8, 16], strides = [1, 1]} : vector<8x64xbf16> to vector<8x16xbf16>
    %cst_47 = arith.constant dense<0.000000e+00> : vector<8x8xf32>
    %97 = tpu.matmul %94, %95, %cst_47 {dimension_numbers = #tpu.dot_dimension_numbers<[1], [1], [0], [0], [0, 0, 1, 0], [], []>} : vector<8x16xbf16>, vector<8x16xbf16>, vector<8x8xf32> -> vector<8x8xf32>
    %cst_48 = arith.constant dense<0xFF800000> : vector<8xf32>
    %98 = vector.multi_reduction <maximumf>, %97, %cst_48 [1] : vector<8x8xf32> to vector<8xf32>
    %99 = vector.shape_cast %98 : vector<8xf32> to vector<8x1xf32>
    %100 = vector.broadcast %99 : vector<8x1xf32> to vector<8x8xf32>
    %101 = arith.subf %97, %100 : vector<8x8xf32>
    %102 = math.exp %101 : vector<8x8xf32>
    %cst_49 = arith.constant dense<0.000000e+00> : vector<8xf32>
    %103 = vector.multi_reduction <add>, %102, %cst_49 [1] : vector<8x8xf32> to vector<8xf32>
    %104 = vector.shape_cast %103 : vector<8xf32> to vector<8x1xf32>
    %105 = tpu.reciprocal %104 {approx = true} : vector<8x1xf32> -> vector<8x1xf32>
    %106 = vector.broadcast %105 : vector<8x1xf32> to vector<8x8xf32>
    %107 = arith.mulf %102, %106 : vector<8x8xf32>
    %108 = arith.truncf %107 : vector<8x8xf32> to vector<8x8xbf16>
    %cst_50 = arith.constant dense<0.000000e+00> : vector<8x16xf32>
    %109 = tpu.matmul %108, %96, %cst_50 {dimension_numbers = #tpu.dot_dimension_numbers<[1], [0], [0], [1], [0, 0, 1, 1], [], []>} : vector<8x8xbf16>, vector<8x16xbf16>, vector<8x16xf32> -> vector<8x16xf32>
    %110 = vector.extract_strided_slice %41 {offsets = [32, 0], sizes = [16, 32], strides = [1, 1]} : vector<64x32xbf16> to vector<16x32xbf16>
    %111 = arith.truncf %109 : vector<8x16xf32> to vector<8x16xbf16>
    %cst_51 = arith.constant dense<0.000000e+00> : vector<8x32xf32>
    %112 = tpu.matmul %111, %110, %cst_51 {dimension_numbers = #tpu.dot_dimension_numbers<[1], [0], [0], [1], [0, 0, 1, 1], [], []>} : vector<8x16xbf16>, vector<16x32xbf16>, vector<8x32xf32> -> vector<8x32xf32>
    %113 = arith.addf %93, %112 : vector<8x32xf32>
    %114 = vector.extract_strided_slice %48 {offsets = [0, 48], sizes = [8, 16], strides = [1, 1]} : vector<8x64xbf16> to vector<8x16xbf16>
    %115 = vector.extract_strided_slice %51 {offsets = [0, 48], sizes = [8, 16], strides = [1, 1]} : vector<8x64xbf16> to vector<8x16xbf16>
    %116 = vector.extract_strided_slice %54 {offsets = [0, 48], sizes = [8, 16], strides = [1, 1]} : vector<8x64xbf16> to vector<8x16xbf16>
    %cst_52 = arith.constant dense<0.000000e+00> : vector<8x8xf32>
    %117 = tpu.matmul %114, %115, %cst_52 {dimension_numbers = #tpu.dot_dimension_numbers<[1], [1], [0], [0], [0, 0, 1, 0], [], []>} : vector<8x16xbf16>, vector<8x16xbf16>, vector<8x8xf32> -> vector<8x8xf32>
    %cst_53 = arith.constant dense<0xFF800000> : vector<8xf32>
    %118 = vector.multi_reduction <maximumf>, %117, %cst_53 [1] : vector<8x8xf32> to vector<8xf32>
    %119 = vector.shape_cast %118 : vector<8xf32> to vector<8x1xf32>
    %120 = vector.broadcast %119 : vector<8x1xf32> to vector<8x8xf32>
    %121 = arith.subf %117, %120 : vector<8x8xf32>
    %122 = math.exp %121 : vector<8x8xf32>
    %cst_54 = arith.constant dense<0.000000e+00> : vector<8xf32>
    %123 = vector.multi_reduction <add>, %122, %cst_54 [1] : vector<8x8xf32> to vector<8xf32>
    %124 = vector.shape_cast %123 : vector<8xf32> to vector<8x1xf32>
    %125 = tpu.reciprocal %124 {approx = true} : vector<8x1xf32> -> vector<8x1xf32>
    %126 = vector.broadcast %125 : vector<8x1xf32> to vector<8x8xf32>
    %127 = arith.mulf %122, %126 : vector<8x8xf32>
    %128 = arith.truncf %127 : vector<8x8xf32> to vector<8x8xbf16>
    %cst_55 = arith.constant dense<0.000000e+00> : vector<8x16xf32>
    %129 = tpu.matmul %128, %116, %cst_55 {dimension_numbers = #tpu.dot_dimension_numbers<[1], [0], [0], [1], [0, 0, 1, 1], [], []>} : vector<8x8xbf16>, vector<8x16xbf16>, vector<8x16xf32> -> vector<8x16xf32>
    %130 = vector.extract_strided_slice %41 {offsets = [48, 0], sizes = [16, 32], strides = [1, 1]} : vector<64x32xbf16> to vector<16x32xbf16>
    %131 = arith.truncf %129 : vector<8x16xf32> to vector<8x16xbf16>
    %cst_56 = arith.constant dense<0.000000e+00> : vector<8x32xf32>
    %132 = tpu.matmul %131, %130, %cst_56 {dimension_numbers = #tpu.dot_dimension_numbers<[1], [0], [0], [1], [0, 0, 1, 1], [], []>} : vector<8x16xbf16>, vector<16x32xbf16>, vector<8x32xf32> -> vector<8x32xf32>
    %133 = arith.addf %113, %132 : vector<8x32xf32>
    %134 = vector.broadcast %43 : vector<1x32xf32> to vector<8x32xf32>
    %135 = arith.addf %133, %134 : vector<8x32xf32>
    %136 = arith.addf %3, %135 : vector<8x32xf32>
    %c0_57 = arith.constant 0 : index
    %c0_58 = arith.constant 0 : index
    %c0_59 = arith.constant 0 : index
    %137 = vector.load %arg12[%c0_57, %c0_58, %c0_59] : memref<1x1x32xf32, #tpu.memory_space<vmem>>, vector<1x1x32xf32>
    %138 = vector.shape_cast %137 : vector<1x1x32xf32> to vector<1x32xf32>
    %c0_60 = arith.constant 0 : index
    %c0_61 = arith.constant 0 : index
    %c0_62 = arith.constant 0 : index
    %139 = vector.load %arg13[%c0_60, %c0_61, %c0_62] : memref<1x1x32xf32, #tpu.memory_space<vmem>>, vector<1x1x32xf32>
    %140 = vector.shape_cast %139 : vector<1x1x32xf32> to vector<1x32xf32>
    %cst_63 = arith.constant dense<0.000000e+00> : vector<8xf32>
    %141 = vector.multi_reduction <add>, %136, %cst_63 [1] : vector<8x32xf32> to vector<8xf32>
    %142 = vector.shape_cast %141 : vector<8xf32> to vector<8x1xf32>
    %cst_64 = arith.constant 3.200000e+01 : f32
    %143 = vector.broadcast %cst_64 : f32 to vector<8x1xf32>
    %144 = arith.divf %142, %143 : vector<8x1xf32>
    %145 = vector.broadcast %144 : vector<8x1xf32> to vector<8x32xf32>
    %146 = arith.subf %136, %145 : vector<8x32xf32>
    %147 = arith.mulf %146, %146 : vector<8x32xf32>
    %cst_65 = arith.constant dense<0.000000e+00> : vector<8xf32>
    %148 = vector.multi_reduction <add>, %147, %cst_65 [1] : vector<8x32xf32> to vector<8xf32>
    %149 = vector.shape_cast %148 : vector<8xf32> to vector<8x1xf32>
    %cst_66 = arith.constant 3.200000e+01 : f32
    %150 = vector.broadcast %cst_66 : f32 to vector<8x1xf32>
    %151 = arith.divf %149, %150 : vector<8x1xf32>
    %152 = vector.broadcast %144 : vector<8x1xf32> to vector<8x32xf32>
    %153 = arith.subf %136, %152 : vector<8x32xf32>
    %cst_67 = arith.constant 9.99999974E-6 : f32
    %154 = vector.broadcast %cst_67 : f32 to vector<8x1xf32>
    %155 = arith.addf %151, %154 : vector<8x1xf32>
    %156 = math.rsqrt %155 : vector<8x1xf32>
    %157 = vector.broadcast %156 : vector<8x1xf32> to vector<8x32xf32>
    %158 = arith.mulf %153, %157 : vector<8x32xf32>
    %159 = vector.broadcast %138 : vector<1x32xf32> to vector<8x32xf32>
    %160 = arith.mulf %158, %159 : vector<8x32xf32>
    %161 = vector.broadcast %140 : vector<1x32xf32> to vector<8x32xf32>
    %162 = arith.addf %160, %161 : vector<8x32xf32>
    %c0_68 = arith.constant 0 : index
    %c0_69 = arith.constant 0 : index
    %c0_70 = arith.constant 0 : index
    %163 = vector.load %arg12[%c0_68, %c0_69, %c0_70] : memref<1x1x32xf32, #tpu.memory_space<vmem>>, vector<1x1x32xf32>
    %164 = vector.shape_cast %163 : vector<1x1x32xf32> to vector<1x32xf32>
    %c0_71 = arith.constant 0 : index
    %c0_72 = arith.constant 0 : index
    %c0_73 = arith.constant 0 : index
    %165 = vector.load %arg13[%c0_71, %c0_72, %c0_73] : memref<1x1x32xf32, #tpu.memory_space<vmem>>, vector<1x1x32xf32>
    %166 = vector.shape_cast %165 : vector<1x1x32xf32> to vector<1x32xf32>
    %cst_74 = arith.constant dense<0.000000e+00> : vector<8xf32>
    %167 = vector.multi_reduction <add>, %5, %cst_74 [1] : vector<8x32xf32> to vector<8xf32>
    %168 = vector.shape_cast %167 : vector<8xf32> to vector<8x1xf32>
    %cst_75 = arith.constant 3.200000e+01 : f32
    %169 = vector.broadcast %cst_75 : f32 to vector<8x1xf32>
    %170 = arith.divf %168, %169 : vector<8x1xf32>
    %171 = vector.broadcast %170 : vector<8x1xf32> to vector<8x32xf32>
    %172 = arith.subf %5, %171 : vector<8x32xf32>
    %173 = arith.mulf %172, %172 : vector<8x32xf32>
    %cst_76 = arith.constant dense<0.000000e+00> : vector<8xf32>
    %174 = vector.multi_reduction <add>, %173, %cst_76 [1] : vector<8x32xf32> to vector<8xf32>
    %175 = vector.shape_cast %174 : vector<8xf32> to vector<8x1xf32>
    %cst_77 = arith.constant 3.200000e+01 : f32
    %176 = vector.broadcast %cst_77 : f32 to vector<8x1xf32>
    %177 = arith.divf %175, %176 : vector<8x1xf32>
    %178 = vector.broadcast %170 : vector<8x1xf32> to vector<8x32xf32>
    %179 = arith.subf %5, %178 : vector<8x32xf32>
    %cst_78 = arith.constant 9.99999974E-6 : f32
    %180 = vector.broadcast %cst_78 : f32 to vector<8x1xf32>
    %181 = arith.addf %177, %180 : vector<8x1xf32>
    %182 = math.rsqrt %181 : vector<8x1xf32>
    %183 = vector.broadcast %182 : vector<8x1xf32> to vector<8x32xf32>
    %184 = arith.mulf %179, %183 : vector<8x32xf32>
    %185 = vector.broadcast %164 : vector<1x32xf32> to vector<8x32xf32>
    %186 = arith.mulf %184, %185 : vector<8x32xf32>
    %187 = vector.broadcast %166 : vector<1x32xf32> to vector<8x32xf32>
    %188 = arith.addf %186, %187 : vector<8x32xf32>
    %c0_79 = arith.constant 0 : index
    %c0_80 = arith.constant 0 : index
    %c0_81 = arith.constant 0 : index
    %189 = vector.load %arg14[%c0_79, %c0_80, %c0_81] : memref<1x32x64xbf16, #tpu.memory_space<vmem>>, vector<1x32x64xbf16>
    %190 = vector.shape_cast %189 : vector<1x32x64xbf16> to vector<32x64xbf16>
    %c0_82 = arith.constant 0 : index
    %c0_83 = arith.constant 0 : index
    %c0_84 = arith.constant 0 : index
    %191 = vector.load %arg15[%c0_82, %c0_83, %c0_84] : memref<1x32x64xbf16, #tpu.memory_space<vmem>>, vector<1x32x64xbf16>
    %192 = vector.shape_cast %191 : vector<1x32x64xbf16> to vector<32x64xbf16>
    %c0_85 = arith.constant 0 : index
    %c0_86 = arith.constant 0 : index
    %c0_87 = arith.constant 0 : index
    %193 = vector.load %arg16[%c0_85, %c0_86, %c0_87] : memref<1x32x64xbf16, #tpu.memory_space<vmem>>, vector<1x32x64xbf16>
    %194 = vector.shape_cast %193 : vector<1x32x64xbf16> to vector<32x64xbf16>
    %c0_88 = arith.constant 0 : index
    %c0_89 = arith.constant 0 : index
    %c0_90 = arith.constant 0 : index
    %195 = vector.load %arg17[%c0_88, %c0_89, %c0_90] : memref<1x64x32xbf16, #tpu.memory_space<vmem>>, vector<1x64x32xbf16>
    %196 = vector.shape_cast %195 : vector<1x64x32xbf16> to vector<64x32xbf16>
    %c0_91 = arith.constant 0 : index
    %c0_92 = arith.constant 0 : index
    %c0_93 = arith.constant 0 : index
    %197 = vector.load %arg18[%c0_91, %c0_92, %c0_93] : memref<1x1x32xf32, #tpu.memory_space<vmem>>, vector<1x1x32xf32>
    %198 = vector.shape_cast %197 : vector<1x1x32xf32> to vector<1x32xf32>
    %199 = arith.truncf %162 : vector<8x32xf32> to vector<8x32xbf16>
    %cst_94 = arith.constant dense<0.000000e+00> : vector<8x64xf32>
    %200 = tpu.matmul %199, %190, %cst_94 {dimension_numbers = #tpu.dot_dimension_numbers<[1], [0], [0], [1], [0, 0, 1, 1], [], []>} : vector<8x32xbf16>, vector<32x64xbf16>, vector<8x64xf32> -> vector<8x64xf32>
    %cst_95 = arith.constant 2.500000e-01 : f32
    %201 = vector.broadcast %cst_95 : f32 to vector<8x64xf32>
    %202 = arith.mulf %200, %201 : vector<8x64xf32>
    %203 = arith.truncf %202 : vector<8x64xf32> to vector<8x64xbf16>
    %204 = arith.truncf %188 : vector<8x32xf32> to vector<8x32xbf16>
    %cst_96 = arith.constant dense<0.000000e+00> : vector<8x64xf32>
    %205 = tpu.matmul %204, %192, %cst_96 {dimension_numbers = #tpu.dot_dimension_numbers<[1], [0], [0], [1], [0, 0, 1, 1], [], []>} : vector<8x32xbf16>, vector<32x64xbf16>, vector<8x64xf32> -> vector<8x64xf32>
    %206 = arith.truncf %205 : vector<8x64xf32> to vector<8x64xbf16>
    %207 = arith.truncf %7 : vector<8x32xf32> to vector<8x32xbf16>
    %cst_97 = arith.constant dense<0.000000e+00> : vector<8x64xf32>
    %208 = tpu.matmul %207, %194, %cst_97 {dimension_numbers = #tpu.dot_dimension_numbers<[1], [0], [0], [1], [0, 0, 1, 1], [], []>} : vector<8x32xbf16>, vector<32x64xbf16>, vector<8x64xf32> -> vector<8x64xf32>
    %209 = arith.truncf %208 : vector<8x64xf32> to vector<8x64xbf16>
    %210 = vector.extract_strided_slice %203 {offsets = [0, 0], sizes = [8, 16], strides = [1, 1]} : vector<8x64xbf16> to vector<8x16xbf16>
    %211 = vector.extract_strided_slice %206 {offsets = [0, 0], sizes = [8, 16], strides = [1, 1]} : vector<8x64xbf16> to vector<8x16xbf16>
    %212 = vector.extract_strided_slice %209 {offsets = [0, 0], sizes = [8, 16], strides = [1, 1]} : vector<8x64xbf16> to vector<8x16xbf16>
    %cst_98 = arith.constant dense<0.000000e+00> : vector<8x8xf32>
    %213 = tpu.matmul %210, %211, %cst_98 {dimension_numbers = #tpu.dot_dimension_numbers<[1], [1], [0], [0], [0, 0, 1, 0], [], []>} : vector<8x16xbf16>, vector<8x16xbf16>, vector<8x8xf32> -> vector<8x8xf32>
    %cst_99 = arith.constant dense<0xFF800000> : vector<8xf32>
    %214 = vector.multi_reduction <maximumf>, %213, %cst_99 [1] : vector<8x8xf32> to vector<8xf32>
    %215 = vector.shape_cast %214 : vector<8xf32> to vector<8x1xf32>
    %216 = vector.broadcast %215 : vector<8x1xf32> to vector<8x8xf32>
    %217 = arith.subf %213, %216 : vector<8x8xf32>
    %218 = math.exp %217 : vector<8x8xf32>
    %cst_100 = arith.constant dense<0.000000e+00> : vector<8xf32>
    %219 = vector.multi_reduction <add>, %218, %cst_100 [1] : vector<8x8xf32> to vector<8xf32>
    %220 = vector.shape_cast %219 : vector<8xf32> to vector<8x1xf32>
    %221 = tpu.reciprocal %220 {approx = true} : vector<8x1xf32> -> vector<8x1xf32>
    %222 = vector.broadcast %221 : vector<8x1xf32> to vector<8x8xf32>
    %223 = arith.mulf %218, %222 : vector<8x8xf32>
    %224 = arith.truncf %223 : vector<8x8xf32> to vector<8x8xbf16>
    %cst_101 = arith.constant dense<0.000000e+00> : vector<8x16xf32>
    %225 = tpu.matmul %224, %212, %cst_101 {dimension_numbers = #tpu.dot_dimension_numbers<[1], [0], [0], [1], [0, 0, 1, 1], [], []>} : vector<8x8xbf16>, vector<8x16xbf16>, vector<8x16xf32> -> vector<8x16xf32>
    %226 = vector.extract_strided_slice %196 {offsets = [0, 0], sizes = [16, 32], strides = [1, 1]} : vector<64x32xbf16> to vector<16x32xbf16>
    %227 = arith.truncf %225 : vector<8x16xf32> to vector<8x16xbf16>
    %cst_102 = arith.constant dense<0.000000e+00> : vector<8x32xf32>
    %228 = tpu.matmul %227, %226, %cst_102 {dimension_numbers = #tpu.dot_dimension_numbers<[1], [0], [0], [1], [0, 0, 1, 1], [], []>} : vector<8x16xbf16>, vector<16x32xbf16>, vector<8x32xf32> -> vector<8x32xf32>
    %229 = vector.extract_strided_slice %203 {offsets = [0, 16], sizes = [8, 16], strides = [1, 1]} : vector<8x64xbf16> to vector<8x16xbf16>
    %230 = vector.extract_strided_slice %206 {offsets = [0, 16], sizes = [8, 16], strides = [1, 1]} : vector<8x64xbf16> to vector<8x16xbf16>
    %231 = vector.extract_strided_slice %209 {offsets = [0, 16], sizes = [8, 16], strides = [1, 1]} : vector<8x64xbf16> to vector<8x16xbf16>
    %cst_103 = arith.constant dense<0.000000e+00> : vector<8x8xf32>
    %232 = tpu.matmul %229, %230, %cst_103 {dimension_numbers = #tpu.dot_dimension_numbers<[1], [1], [0], [0], [0, 0, 1, 0], [], []>} : vector<8x16xbf16>, vector<8x16xbf16>, vector<8x8xf32> -> vector<8x8xf32>
    %cst_104 = arith.constant dense<0xFF800000> : vector<8xf32>
    %233 = vector.multi_reduction <maximumf>, %232, %cst_104 [1] : vector<8x8xf32> to vector<8xf32>
    %234 = vector.shape_cast %233 : vector<8xf32> to vector<8x1xf32>
    %235 = vector.broadcast %234 : vector<8x1xf32> to vector<8x8xf32>
    %236 = arith.subf %232, %235 : vector<8x8xf32>
    %237 = math.exp %236 : vector<8x8xf32>
    %cst_105 = arith.constant dense<0.000000e+00> : vector<8xf32>
    %238 = vector.multi_reduction <add>, %237, %cst_105 [1] : vector<8x8xf32> to vector<8xf32>
    %239 = vector.shape_cast %238 : vector<8xf32> to vector<8x1xf32>
    %240 = tpu.reciprocal %239 {approx = true} : vector<8x1xf32> -> vector<8x1xf32>
    %241 = vector.broadcast %240 : vector<8x1xf32> to vector<8x8xf32>
    %242 = arith.mulf %237, %241 : vector<8x8xf32>
    %243 = arith.truncf %242 : vector<8x8xf32> to vector<8x8xbf16>
    %cst_106 = arith.constant dense<0.000000e+00> : vector<8x16xf32>
    %244 = tpu.matmul %243, %231, %cst_106 {dimension_numbers = #tpu.dot_dimension_numbers<[1], [0], [0], [1], [0, 0, 1, 1], [], []>} : vector<8x8xbf16>, vector<8x16xbf16>, vector<8x16xf32> -> vector<8x16xf32>
    %245 = vector.extract_strided_slice %196 {offsets = [16, 0], sizes = [16, 32], strides = [1, 1]} : vector<64x32xbf16> to vector<16x32xbf16>
    %246 = arith.truncf %244 : vector<8x16xf32> to vector<8x16xbf16>
    %cst_107 = arith.constant dense<0.000000e+00> : vector<8x32xf32>
    %247 = tpu.matmul %246, %245, %cst_107 {dimension_numbers = #tpu.dot_dimension_numbers<[1], [0], [0], [1], [0, 0, 1, 1], [], []>} : vector<8x16xbf16>, vector<16x32xbf16>, vector<8x32xf32> -> vector<8x32xf32>
    %248 = arith.addf %228, %247 : vector<8x32xf32>
    %249 = vector.extract_strided_slice %203 {offsets = [0, 32], sizes = [8, 16], strides = [1, 1]} : vector<8x64xbf16> to vector<8x16xbf16>
    %250 = vector.extract_strided_slice %206 {offsets = [0, 32], sizes = [8, 16], strides = [1, 1]} : vector<8x64xbf16> to vector<8x16xbf16>
    %251 = vector.extract_strided_slice %209 {offsets = [0, 32], sizes = [8, 16], strides = [1, 1]} : vector<8x64xbf16> to vector<8x16xbf16>
    %cst_108 = arith.constant dense<0.000000e+00> : vector<8x8xf32>
    %252 = tpu.matmul %249, %250, %cst_108 {dimension_numbers = #tpu.dot_dimension_numbers<[1], [1], [0], [0], [0, 0, 1, 0], [], []>} : vector<8x16xbf16>, vector<8x16xbf16>, vector<8x8xf32> -> vector<8x8xf32>
    %cst_109 = arith.constant dense<0xFF800000> : vector<8xf32>
    %253 = vector.multi_reduction <maximumf>, %252, %cst_109 [1] : vector<8x8xf32> to vector<8xf32>
    %254 = vector.shape_cast %253 : vector<8xf32> to vector<8x1xf32>
    %255 = vector.broadcast %254 : vector<8x1xf32> to vector<8x8xf32>
    %256 = arith.subf %252, %255 : vector<8x8xf32>
    %257 = math.exp %256 : vector<8x8xf32>
    %cst_110 = arith.constant dense<0.000000e+00> : vector<8xf32>
    %258 = vector.multi_reduction <add>, %257, %cst_110 [1] : vector<8x8xf32> to vector<8xf32>
    %259 = vector.shape_cast %258 : vector<8xf32> to vector<8x1xf32>
    %260 = tpu.reciprocal %259 {approx = true} : vector<8x1xf32> -> vector<8x1xf32>
    %261 = vector.broadcast %260 : vector<8x1xf32> to vector<8x8xf32>
    %262 = arith.mulf %257, %261 : vector<8x8xf32>
    %263 = arith.truncf %262 : vector<8x8xf32> to vector<8x8xbf16>
    %cst_111 = arith.constant dense<0.000000e+00> : vector<8x16xf32>
    %264 = tpu.matmul %263, %251, %cst_111 {dimension_numbers = #tpu.dot_dimension_numbers<[1], [0], [0], [1], [0, 0, 1, 1], [], []>} : vector<8x8xbf16>, vector<8x16xbf16>, vector<8x16xf32> -> vector<8x16xf32>
    %265 = vector.extract_strided_slice %196 {offsets = [32, 0], sizes = [16, 32], strides = [1, 1]} : vector<64x32xbf16> to vector<16x32xbf16>
    %266 = arith.truncf %264 : vector<8x16xf32> to vector<8x16xbf16>
    %cst_112 = arith.constant dense<0.000000e+00> : vector<8x32xf32>
    %267 = tpu.matmul %266, %265, %cst_112 {dimension_numbers = #tpu.dot_dimension_numbers<[1], [0], [0], [1], [0, 0, 1, 1], [], []>} : vector<8x16xbf16>, vector<16x32xbf16>, vector<8x32xf32> -> vector<8x32xf32>
    %268 = arith.addf %248, %267 : vector<8x32xf32>
    %269 = vector.extract_strided_slice %203 {offsets = [0, 48], sizes = [8, 16], strides = [1, 1]} : vector<8x64xbf16> to vector<8x16xbf16>
    %270 = vector.extract_strided_slice %206 {offsets = [0, 48], sizes = [8, 16], strides = [1, 1]} : vector<8x64xbf16> to vector<8x16xbf16>
    %271 = vector.extract_strided_slice %209 {offsets = [0, 48], sizes = [8, 16], strides = [1, 1]} : vector<8x64xbf16> to vector<8x16xbf16>
    %cst_113 = arith.constant dense<0.000000e+00> : vector<8x8xf32>
    %272 = tpu.matmul %269, %270, %cst_113 {dimension_numbers = #tpu.dot_dimension_numbers<[1], [1], [0], [0], [0, 0, 1, 0], [], []>} : vector<8x16xbf16>, vector<8x16xbf16>, vector<8x8xf32> -> vector<8x8xf32>
    %cst_114 = arith.constant dense<0xFF800000> : vector<8xf32>
    %273 = vector.multi_reduction <maximumf>, %272, %cst_114 [1] : vector<8x8xf32> to vector<8xf32>
    %274 = vector.shape_cast %273 : vector<8xf32> to vector<8x1xf32>
    %275 = vector.broadcast %274 : vector<8x1xf32> to vector<8x8xf32>
    %276 = arith.subf %272, %275 : vector<8x8xf32>
    %277 = math.exp %276 : vector<8x8xf32>
    %cst_115 = arith.constant dense<0.000000e+00> : vector<8xf32>
    %278 = vector.multi_reduction <add>, %277, %cst_115 [1] : vector<8x8xf32> to vector<8xf32>
    %279 = vector.shape_cast %278 : vector<8xf32> to vector<8x1xf32>
    %280 = tpu.reciprocal %279 {approx = true} : vector<8x1xf32> -> vector<8x1xf32>
    %281 = vector.broadcast %280 : vector<8x1xf32> to vector<8x8xf32>
    %282 = arith.mulf %277, %281 : vector<8x8xf32>
    %283 = arith.truncf %282 : vector<8x8xf32> to vector<8x8xbf16>
    %cst_116 = arith.constant dense<0.000000e+00> : vector<8x16xf32>
    %284 = tpu.matmul %283, %271, %cst_116 {dimension_numbers = #tpu.dot_dimension_numbers<[1], [0], [0], [1], [0, 0, 1, 1], [], []>} : vector<8x8xbf16>, vector<8x16xbf16>, vector<8x16xf32> -> vector<8x16xf32>
    %285 = vector.extract_strided_slice %196 {offsets = [48, 0], sizes = [16, 32], strides = [1, 1]} : vector<64x32xbf16> to vector<16x32xbf16>
    %286 = arith.truncf %284 : vector<8x16xf32> to vector<8x16xbf16>
    %cst_117 = arith.constant dense<0.000000e+00> : vector<8x32xf32>
    %287 = tpu.matmul %286, %285, %cst_117 {dimension_numbers = #tpu.dot_dimension_numbers<[1], [0], [0], [1], [0, 0, 1, 1], [], []>} : vector<8x16xbf16>, vector<16x32xbf16>, vector<8x32xf32> -> vector<8x32xf32>
    %288 = arith.addf %268, %287 : vector<8x32xf32>
    %289 = vector.broadcast %198 : vector<1x32xf32> to vector<8x32xf32>
    %290 = arith.addf %288, %289 : vector<8x32xf32>
    %291 = arith.addf %136, %290 : vector<8x32xf32>
    %c0_118 = arith.constant 0 : index
    %c0_119 = arith.constant 0 : index
    %c0_120 = arith.constant 0 : index
    %292 = vector.load %arg19[%c0_118, %c0_119, %c0_120] : memref<1x1x32xf32, #tpu.memory_space<vmem>>, vector<1x1x32xf32>
    %293 = vector.shape_cast %292 : vector<1x1x32xf32> to vector<1x32xf32>
    %c0_121 = arith.constant 0 : index
    %c0_122 = arith.constant 0 : index
    %c0_123 = arith.constant 0 : index
    %294 = vector.load %arg20[%c0_121, %c0_122, %c0_123] : memref<1x1x32xf32, #tpu.memory_space<vmem>>, vector<1x1x32xf32>
    %295 = vector.shape_cast %294 : vector<1x1x32xf32> to vector<1x32xf32>
    %cst_124 = arith.constant dense<0.000000e+00> : vector<8xf32>
    %296 = vector.multi_reduction <add>, %291, %cst_124 [1] : vector<8x32xf32> to vector<8xf32>
    %297 = vector.shape_cast %296 : vector<8xf32> to vector<8x1xf32>
    %cst_125 = arith.constant 3.200000e+01 : f32
    %298 = vector.broadcast %cst_125 : f32 to vector<8x1xf32>
    %299 = arith.divf %297, %298 : vector<8x1xf32>
    %300 = vector.broadcast %299 : vector<8x1xf32> to vector<8x32xf32>
    %301 = arith.subf %291, %300 : vector<8x32xf32>
    %302 = arith.mulf %301, %301 : vector<8x32xf32>
    %cst_126 = arith.constant dense<0.000000e+00> : vector<8xf32>
    %303 = vector.multi_reduction <add>, %302, %cst_126 [1] : vector<8x32xf32> to vector<8xf32>
    %304 = vector.shape_cast %303 : vector<8xf32> to vector<8x1xf32>
    %cst_127 = arith.constant 3.200000e+01 : f32
    %305 = vector.broadcast %cst_127 : f32 to vector<8x1xf32>
    %306 = arith.divf %304, %305 : vector<8x1xf32>
    %307 = vector.broadcast %299 : vector<8x1xf32> to vector<8x32xf32>
    %308 = arith.subf %291, %307 : vector<8x32xf32>
    %cst_128 = arith.constant 9.99999974E-6 : f32
    %309 = vector.broadcast %cst_128 : f32 to vector<8x1xf32>
    %310 = arith.addf %306, %309 : vector<8x1xf32>
    %311 = math.rsqrt %310 : vector<8x1xf32>
    %312 = vector.broadcast %311 : vector<8x1xf32> to vector<8x32xf32>
    %313 = arith.mulf %308, %312 : vector<8x32xf32>
    %314 = vector.broadcast %293 : vector<1x32xf32> to vector<8x32xf32>
    %315 = arith.mulf %313, %314 : vector<8x32xf32>
    %316 = vector.broadcast %295 : vector<1x32xf32> to vector<8x32xf32>
    %317 = arith.addf %315, %316 : vector<8x32xf32>
    %c0_129 = arith.constant 0 : index
    %c0_130 = arith.constant 0 : index
    %c0_131 = arith.constant 0 : index
    %318 = vector.load %arg21[%c0_129, %c0_130, %c0_131] : memref<1x32x64xbf16, #tpu.memory_space<vmem>>, vector<1x32x64xbf16>
    %319 = vector.shape_cast %318 : vector<1x32x64xbf16> to vector<32x64xbf16>
    %320 = arith.truncf %317 : vector<8x32xf32> to vector<8x32xbf16>
    %cst_132 = arith.constant dense<0.000000e+00> : vector<8x64xf32>
    %321 = tpu.matmul %320, %319, %cst_132 {dimension_numbers = #tpu.dot_dimension_numbers<[1], [0], [0], [1], [0, 0, 1, 1], [], []>} : vector<8x32xbf16>, vector<32x64xbf16>, vector<8x64xf32> -> vector<8x64xf32>
    %c0_133 = arith.constant 0 : index
    %c0_134 = arith.constant 0 : index
    %c0_135 = arith.constant 0 : index
    %322 = vector.load %arg22[%c0_133, %c0_134, %c0_135] : memref<1x1x64xf32, #tpu.memory_space<vmem>>, vector<1x1x64xf32>
    %323 = vector.shape_cast %322 : vector<1x1x64xf32> to vector<1x64xf32>
    %324 = vector.broadcast %323 : vector<1x64xf32> to vector<8x64xf32>
    %325 = arith.addf %321, %324 : vector<8x64xf32>
    %cst_136 = arith.constant 5.000000e-01 : f32
    %326 = vector.broadcast %cst_136 : f32 to vector<8x64xf32>
    %327 = arith.mulf %326, %325 : vector<8x64xf32>
    %cst_137 = arith.constant 0.707106769 : f32
    %328 = vector.broadcast %cst_137 : f32 to vector<8x64xf32>
    %329 = arith.mulf %325, %328 : vector<8x64xf32>
    %330 = math.erf %329 : vector<8x64xf32>
    %cst_138 = arith.constant 1.000000e+00 : f32
    %331 = vector.broadcast %cst_138 : f32 to vector<8x64xf32>
    %332 = arith.addf %331, %330 : vector<8x64xf32>
    %333 = arith.mulf %327, %332 : vector<8x64xf32>
    %c0_139 = arith.constant 0 : index
    %c0_140 = arith.constant 0 : index
    %c0_141 = arith.constant 0 : index
    %334 = vector.load %arg23[%c0_139, %c0_140, %c0_141] : memref<1x64x32xbf16, #tpu.memory_space<vmem>>, vector<1x64x32xbf16>
    %335 = vector.shape_cast %334 : vector<1x64x32xbf16> to vector<64x32xbf16>
    %336 = arith.truncf %333 : vector<8x64xf32> to vector<8x64xbf16>
    %cst_142 = arith.constant dense<0.000000e+00> : vector<8x32xf32>
    %337 = tpu.matmul %336, %335, %cst_142 {dimension_numbers = #tpu.dot_dimension_numbers<[1], [0], [0], [1], [0, 0, 1, 1], [], []>} : vector<8x64xbf16>, vector<64x32xbf16>, vector<8x32xf32> -> vector<8x32xf32>
    %338 = arith.addf %291, %337 : vector<8x32xf32>
    %c0_143 = arith.constant 0 : index
    %c0_144 = arith.constant 0 : index
    %c0_145 = arith.constant 0 : index
    %339 = vector.load %arg24[%c0_143, %c0_144, %c0_145] : memref<1x1x32xf32, #tpu.memory_space<vmem>>, vector<1x1x32xf32>
    %340 = vector.shape_cast %339 : vector<1x1x32xf32> to vector<1x32xf32>
    %341 = vector.broadcast %340 : vector<1x32xf32> to vector<8x32xf32>
    %342 = arith.addf %338, %341 : vector<8x32xf32>
    %c0_146 = arith.constant 0 : index
    %c0_147 = arith.constant 0 : index
    %343 = vector.load %arg28[%c0_146, %c0_147] : memref<8x32xf32, #tpu.memory_space<vmem>>, vector<8x32xf32>
    tpu.vector_store %arg28[%c0_146, %c0_147], %342 {strides = array<i32>} : memref<8x32xf32, #tpu.memory_space<vmem>>, vector<8x32xf32>,
    %c1_i32 = arith.constant 1 : i32
    %344 = arith.cmpi eq, %arg1, %c1_i32 : i32
    %345 = arith.extui %344 : i1 to i32
    %c0_i32_148 = arith.constant 0 : i32
    %346 = arith.cmpi ne, %345, %c0_i32_148 : i32
    scf.if %346 {
      %c0_149 = arith.constant 0 : index
      %c0_150 = arith.constant 0 : index
      %347 = vector.load %arg25[%c0_149, %c0_150] : memref<1x32xf32, #tpu.memory_space<vmem>>, vector<1x32xf32>
      %c0_151 = arith.constant 0 : index
      %c0_152 = arith.constant 0 : index
      %348 = vector.load %arg26[%c0_151, %c0_152] : memref<1x32xf32, #tpu.memory_space<vmem>>, vector<1x32xf32>
      %cst_153 = arith.constant dense<0.000000e+00> : vector<8xf32>
      %349 = vector.multi_reduction <add>, %342, %cst_153 [1] : vector<8x32xf32> to vector<8xf32>
      %350 = vector.shape_cast %349 : vector<8xf32> to vector<8x1xf32>
      %cst_154 = arith.constant 3.200000e+01 : f32
      %351 = vector.broadcast %cst_154 : f32 to vector<8x1xf32>
      %352 = arith.divf %350, %351 : vector<8x1xf32>
      %353 = vector.broadcast %352 : vector<8x1xf32> to vector<8x32xf32>
      %354 = arith.subf %342, %353 : vector<8x32xf32>
      %355 = arith.mulf %354, %354 : vector<8x32xf32>
      %cst_155 = arith.constant dense<0.000000e+00> : vector<8xf32>
      %356 = vector.multi_reduction <add>, %355, %cst_155 [1] : vector<8x32xf32> to vector<8xf32>
      %357 = vector.shape_cast %356 : vector<8xf32> to vector<8x1xf32>
      %cst_156 = arith.constant 3.200000e+01 : f32
      %358 = vector.broadcast %cst_156 : f32 to vector<8x1xf32>
      %359 = arith.divf %357, %358 : vector<8x1xf32>
      %360 = vector.broadcast %352 : vector<8x1xf32> to vector<8x32xf32>
      %361 = arith.subf %342, %360 : vector<8x32xf32>
      %cst_157 = arith.constant 9.99999974E-6 : f32
      %362 = vector.broadcast %cst_157 : f32 to vector<8x1xf32>
      %363 = arith.addf %359, %362 : vector<8x1xf32>
      %364 = math.rsqrt %363 : vector<8x1xf32>
      %365 = vector.broadcast %364 : vector<8x1xf32> to vector<8x32xf32>
      %366 = arith.mulf %361, %365 : vector<8x32xf32>
      %367 = vector.broadcast %347 : vector<1x32xf32> to vector<8x32xf32>
      %368 = arith.mulf %366, %367 : vector<8x32xf32>
      %369 = vector.broadcast %348 : vector<1x32xf32> to vector<8x32xf32>
      %370 = arith.addf %368, %369 : vector<8x32xf32>
      %cst_158 = arith.constant 0.000000e+00 : f32
      %371 = vector.broadcast %cst_158 : f32 to vector<8x32xf32>
      %372 = arith.subf %371, %370 : vector<8x32xf32>
      %373 = math.exp %372 : vector<8x32xf32>
      %cst_159 = arith.constant 1.000000e+00 : f32
      %374 = vector.broadcast %cst_159 : f32 to vector<8x32xf32>
      %375 = arith.addf %374, %373 : vector<8x32xf32>
      %cst_160 = arith.constant 1.000000e+00 : f32
      %376 = vector.broadcast %cst_160 : f32 to vector<8x32xf32>
      %377 = arith.divf %376, %375 : vector<8x32xf32>
      %c0_161 = arith.constant 0 : index
      %c0_162 = arith.constant 0 : index
      %c0_163 = arith.constant 0 : index
      %378 = vector.load %arg27[%c0_161, %c0_162, %c0_163] : memref<1x8x32xf32, #tpu.memory_space<vmem>>, vector<1x8x32xf32>
      %379 = vector.shape_cast %378 : vector<1x8x32xf32> to vector<8x32xf32>
      %380 = vector.shape_cast %377 : vector<8x32xf32> to vector<1x8x32xf32>
      tpu.vector_store %arg27[%c0_161, %c0_162, %c0_163], %380 {strides = array<i32>} : memref<1x8x32xf32, #tpu.memory_space<vmem>>, vector<1x8x32xf32>,
    } else {
    }
    return
  }
  func.func @transform_0(%arg0: i32, %arg1: i32) -> (i32, i32, i32) {
    %c0_i32 = arith.constant 0 : i32
    %c0_i32_0 = arith.constant 0 : i32
    %c0_i32_1 = arith.constant 0 : i32
    return %arg0, %c0_i32, %c0_i32_0 : i32, i32, i32
  }
  func.func @transform_1(%arg0: i32, %arg1: i32) -> (i32, i32, i32) {
    %c0_i32 = arith.constant 0 : i32
    %c0_i32_0 = arith.constant 0 : i32
    %c0_i32_1 = arith.constant 0 : i32
    return %arg0, %c0_i32, %c0_i32_0 : i32, i32, i32
  }
  func.func @transform_2(%arg0: i32, %arg1: i32) -> (i32, i32, i32) {
    %c0_i32 = arith.constant 0 : i32
    %c0_i32_0 = arith.constant 0 : i32
    %c0_i32_1 = arith.constant 0 : i32
    return %arg0, %c0_i32, %c0_i32_0 : i32, i32, i32
  }
  func.func @transform_3(%arg0: i32, %arg1: i32) -> (i32, i32, i32) {
    %c0_i32 = arith.constant 0 : i32
    %c0_i32_0 = arith.constant 0 : i32
    %c0_i32_1 = arith.constant 0 : i32
    return %arg1, %c0_i32, %c0_i32_0 : i32, i32, i32
  }
  func.func @transform_4(%arg0: i32, %arg1: i32) -> (i32, i32, i32) {
    %c0_i32 = arith.constant 0 : i32
    %c0_i32_0 = arith.constant 0 : i32
    %c0_i32_1 = arith.constant 0 : i32
    return %arg1, %c0_i32, %c0_i32_0 : i32, i32, i32
  }
  func.func @transform_5(%arg0: i32, %arg1: i32) -> (i32, i32, i32) {
    %c0_i32 = arith.constant 0 : i32
    %c0_i32_0 = arith.constant 0 : i32
    %c0_i32_1 = arith.constant 0 : i32
    return %arg1, %c0_i32, %c0_i32_0 : i32, i32, i32
  }
  func.func @transform_6(%arg0: i32, %arg1: i32) -> (i32, i32, i32) {
    %c0_i32 = arith.constant 0 : i32
    %c0_i32_0 = arith.constant 0 : i32
    %c0_i32_1 = arith.constant 0 : i32
    return %arg1, %c0_i32, %c0_i32_0 : i32, i32, i32
  }
  func.func @transform_7(%arg0: i32, %arg1: i32) -> (i32, i32, i32) {
    %c0_i32 = arith.constant 0 : i32
    %c0_i32_0 = arith.constant 0 : i32
    %c0_i32_1 = arith.constant 0 : i32
    return %arg1, %c0_i32, %c0_i32_0 : i32, i32, i32
  }
  func.func @transform_8(%arg0: i32, %arg1: i32) -> (i32, i32, i32) {
    %c0_i32 = arith.constant 0 : i32
    %c0_i32_0 = arith.constant 0 : i32
    %c0_i32_1 = arith.constant 0 : i32
    return %arg1, %c0_i32, %c0_i32_0 : i32, i32, i32
  }
  func.func @transform_9(%arg0: i32, %arg1: i32) -> (i32, i32, i32) {
    %c0_i32 = arith.constant 0 : i32
    %c0_i32_0 = arith.constant 0 : i32
    %c0_i32_1 = arith.constant 0 : i32
    return %arg1, %c0_i32, %c0_i32_0 : i32, i32, i32
  }
  func.func @transform_10(%arg0: i32, %arg1: i32) -> (i32, i32, i32) {
    %c0_i32 = arith.constant 0 : i32
    %c0_i32_0 = arith.constant 0 : i32
    %c0_i32_1 = arith.constant 0 : i32
    return %arg1, %c0_i32, %c0_i32_0 : i32, i32, i32
  }
  func.func @transform_11(%arg0: i32, %arg1: i32) -> (i32, i32, i32) {
    %c0_i32 = arith.constant 0 : i32
    %c0_i32_0 = arith.constant 0 : i32
    %c0_i32_1 = arith.constant 0 : i32
    return %arg1, %c0_i32, %c0_i32_0 : i32, i32, i32
  }
  func.func @transform_12(%arg0: i32, %arg1: i32) -> (i32, i32, i32) {
    %c0_i32 = arith.constant 0 : i32
    %c0_i32_0 = arith.constant 0 : i32
    %c0_i32_1 = arith.constant 0 : i32
    return %arg1, %c0_i32, %c0_i32_0 : i32, i32, i32
  }
  func.func @transform_13(%arg0: i32, %arg1: i32) -> (i32, i32, i32) {
    %c0_i32 = arith.constant 0 : i32
    %c0_i32_0 = arith.constant 0 : i32
    %c0_i32_1 = arith.constant 0 : i32
    return %arg1, %c0_i32, %c0_i32_0 : i32, i32, i32
  }
  func.func @transform_14(%arg0: i32, %arg1: i32) -> (i32, i32, i32) {
    %c0_i32 = arith.constant 0 : i32
    %c0_i32_0 = arith.constant 0 : i32
    %c0_i32_1 = arith.constant 0 : i32
    return %arg1, %c0_i32, %c0_i32_0 : i32, i32, i32
  }
  func.func @transform_15(%arg0: i32, %arg1: i32) -> (i32, i32, i32) {
    %c0_i32 = arith.constant 0 : i32
    %c0_i32_0 = arith.constant 0 : i32
    %c0_i32_1 = arith.constant 0 : i32
    return %arg1, %c0_i32, %c0_i32_0 : i32, i32, i32
  }
  func.func @transform_16(%arg0: i32, %arg1: i32) -> (i32, i32, i32) {
    %c0_i32 = arith.constant 0 : i32
    %c0_i32_0 = arith.constant 0 : i32
    %c0_i32_1 = arith.constant 0 : i32
    return %arg1, %c0_i32, %c0_i32_0 : i32, i32, i32
  }
  func.func @transform_17(%arg0: i32, %arg1: i32) -> (i32, i32, i32) {
    %c0_i32 = arith.constant 0 : i32
    %c0_i32_0 = arith.constant 0 : i32
    %c0_i32_1 = arith.constant 0 : i32
    return %arg1, %c0_i32, %c0_i32_0 : i32, i32, i32
  }
  func.func @transform_18(%arg0: i32, %arg1: i32) -> (i32, i32, i32) {
    %c0_i32 = arith.constant 0 : i32
    %c0_i32_0 = arith.constant 0 : i32
    %c0_i32_1 = arith.constant 0 : i32
    return %arg1, %c0_i32, %c0_i32_0 : i32, i32, i32
  }
  func.func @transform_19(%arg0: i32, %arg1: i32) -> (i32, i32, i32) {
    %c0_i32 = arith.constant 0 : i32
    %c0_i32_0 = arith.constant 0 : i32
    %c0_i32_1 = arith.constant 0 : i32
    return %arg1, %c0_i32, %c0_i32_0 : i32, i32, i32
  }
  func.func @transform_20(%arg0: i32, %arg1: i32) -> (i32, i32, i32) {
    %c0_i32 = arith.constant 0 : i32
    %c0_i32_0 = arith.constant 0 : i32
    %c0_i32_1 = arith.constant 0 : i32
    return %arg1, %c0_i32, %c0_i32_0 : i32, i32, i32
  }
  func.func @transform_21(%arg0: i32, %arg1: i32) -> (i32, i32, i32) {
    %c0_i32 = arith.constant 0 : i32
    %c0_i32_0 = arith.constant 0 : i32
    %c0_i32_1 = arith.constant 0 : i32
    return %arg1, %c0_i32, %c0_i32_0 : i32, i32, i32
  }
  func.func @transform_22(%arg0: i32, %arg1: i32) -> (i32, i32, i32) {
    %c0_i32 = arith.constant 0 : i32
    %c0_i32_0 = arith.constant 0 : i32
    %c0_i32_1 = arith.constant 0 : i32
    return %arg1, %c0_i32, %c0_i32_0 : i32, i32, i32
  }
  func.func @transform_23(%arg0: i32, %arg1: i32) -> (i32, i32) {
    %c0_i32 = arith.constant 0 : i32
    %c0_i32_0 = arith.constant 0 : i32
    %c0_i32_1 = arith.constant 0 : i32
    return %c0_i32, %c0_i32_0 : i32, i32
  }
  func.func @transform_24(%arg0: i32, %arg1: i32) -> (i32, i32) {
    %c0_i32 = arith.constant 0 : i32
    %c0_i32_0 = arith.constant 0 : i32
    %c0_i32_1 = arith.constant 0 : i32
    return %c0_i32, %c0_i32_0 : i32, i32
  }
  func.func @transform_25(%arg0: i32, %arg1: i32) -> (i32, i32, i32) {
    %c0_i32 = arith.constant 0 : i32
    %c0_i32_0 = arith.constant 0 : i32
    %c0_i32_1 = arith.constant 0 : i32
    return %arg0, %c0_i32, %c0_i32_0 : i32, i32, i32
  }
}

</mosaic_0001>

<bundles_post_ra>
// kernel: transformer_forward.1
= control target key start
LH: loop header
LB: loop body
LE: loop exit
PB: predicated region body
PF: predicated region fallthrough
CT: control target
= control target key end

     0   :  { %s4302_s0 = inlined_call_operand.hbm [shape: f32[2,8,32], index: 0, kind: input, shape index: {}]   ;;  %s4303_s1 = inlined_call_operand.hbm [shape: f32[2,8,32], index: 1, kind: input, shape index: {}]   ;;  %s4304_s2 = inlined_call_operand.hbm [shape: f32[2,8,32], index: 2, kind: input, shape index: {}]   ;;  %s4305_s3 = inlined_call_operand.vmem [shape: f32[2,1,32], index: 3, kind: input, shape index: {}]   ;;  %s4306_s4 = inlined_call_operand.hbm [shape: f32[2,1,32], index: 4, kind: input, shape index: {}]   ;;  %s4307_s5 = inlined_call_operand.vmem [shape: bf16[2,32,64], index: 5, kind: input, shape index: {}]   ;;  %s4308_s6 = inlined_call_operand.vmem [shape: bf16[2,32,64], index: 6, kind: input, shape index: {}]   ;;  %s4309_s7 = inlined_call_operand.vmem [shape: bf16[2,32,64], index: 7, kind: input, shape index: {}]   ;;  %s4310_s8 = inlined_call_operand.vmem [shape: bf16[2,64,32], index: 8, kind: input, shape index: {}]   ;;  %s4311_s9 = inlined_call_operand.hbm [shape: f32[2,1,32], index: 9, kind: input, shape index: {}]   ;;  %s4312_s10 = inlined_call_operand.vmem [shape: f32[2,1,32], index: 10, kind: input, shape index: {}]   ;;  %s4313_s11 = inlined_call_operand.vmem [shape: f32[2,1,32], index: 11, kind: input, shape index: {}]   ;;  %s4314_s12 = inlined_call_operand.vmem [shape: bf16[2,32,64], index: 12, kind: input, shape index: {}]   ;;  %s4315_s13 = inlined_call_operand.vmem [shape: bf16[2,32,64], index: 13, kind: input, shape index: {}]   ;;  %s4316_s14 = inlined_call_operand.vmem [shape: bf16[2,32,64], index: 14, kind: input, shape index: {}]   ;;  %s4317_s15 = inlined_call_operand.vmem [shape: bf16[2,64,32], index: 15, kind: input, shape index: {}]   ;;  %s4318_s16 = inlined_call_operand.hbm [shape: f32[2,1,32], index: 16, kind: input, shape index: {}]   ;;  %s4319_s17 = inlined_call_operand.vmem [shape: f32[2,1,32], index: 17, kind: input, shape index: {}]   ;;  %s4320_s18 = inlined_call_operand.vmem [shape: f32[2,1,32], index: 18, kind: input, shape index: {}]   ;;  %s4321_s19 = inlined_call_operand.vmem [shape: bf16[2,32,64], index: 19, kind: input, shape index: {}]   ;;  %s4322_s20 = inlined_call_operand.vmem [shape: f32[2,1,64], index: 20, kind: input, shape index: {}]   ;;  %s4323_s21 = inlined_call_operand.vmem [shape: bf16[2,64,32], index: 21, kind: input, shape index: {}]   ;;  %s4324_s22 = inlined_call_operand.vmem [shape: f32[2,1,32], index: 22, kind: input, shape index: {}]   ;;  %s4325_s23 = inlined_call_operand.vmem [shape: f32[1,32], index: 23, kind: input, shape index: {}]   ;;  %s4326_s24 = inlined_call_operand.vmem [shape: f32[1,32], index: 24, kind: input, shape index: {}]   ;;  %s4327_s25 = inlined_call_operand.hbm [shape: f32[2,8,32], index: 25, kind: output, shape index: {}]  }
   0x1   :  { %4351 = sst [smem:[#allocation40_spill]] %s4302_s0 }
   0x2   :  { %4352 = sst [smem:[#allocation41_spill]] %s4303_s1 }
   0x3   :  { %4353 = sst [smem:[#allocation42_spill]] %s4304_s2 }
   0x4   :  { %4354 = sst [smem:[#allocation43_spill]] %s4305_s3 }
   0x5   :  { %4355 = sst [smem:[#allocation44_spill]] %s4306_s4 }
   0x6   :  { %4356 = sst [smem:[#allocation45_spill]] %s4307_s5 }
   0x7   :  { %4357 = sst [smem:[#allocation46_spill]] %s4308_s6 }
   0x8   :  { %4358 = sst [smem:[#allocation47_spill]] %s4309_s7 }
   0x9   :  { %4359 = sst [smem:[#allocation48_spill]] %s4310_s8 }
   0xa   :  { %4360 = sst [smem:[#allocation49_spill]] %s4311_s9 }
   0xb   :  { %4361 = sst [smem:[#allocation50_spill]] %s4312_s10 }
   0xc   :  { %4362 = sst [smem:[#allocation51_spill]] %s4313_s11 }
   0xd   :  { %4363 = sst [smem:[#allocation52_spill]] %s4314_s12 }
   0xe   :  { %4364 = sst [smem:[#allocation53_spill]] %s4315_s13 }
   0xf   :  { %4365 = sst [smem:[#allocation54_spill]] %s4316_s14 }
  0x10   :  { %4366 = sst [smem:[#allocation55_spill]] %s4317_s15 }
  0x11   :  { %4367 = sst [smem:[#allocation56_spill]] %s4318_s16 }
  0x12   :  { %4368 = sst [smem:[#allocation57_spill]] %s4319_s17 }
  0x13   :  { %4369 = sst [smem:[#allocation58_spill]] %s4320_s18 }
  0x14   :  { %4370 = sst [smem:[#allocation59_spill]] %s4321_s19 }
  0x15   :  { %4371 = sst [smem:[#allocation60_spill]] %s4322_s20 }
  0x16   :  { %4372 = sst [smem:[#allocation61_spill]] %s4323_s21 }
  0x17   :  { %4373 = sst [smem:[#allocation62_spill]] %s4324_s22 }
  0x18   :  { %4374 = sst [smem:[#allocation63_spill]] %s4325_s23 }
  0x19   :  { %4375 = sst [smem:[#allocation64_spill]] %s4326_s24 }
  0x1a   :  { %4376 = sst [smem:[#allocation65_spill]] %s4327_s25 }
  0x1b   :  { %30 = vsyncpa [#allocation4], 0 }
  0x1c   :  { %32 = vsyncpa [#allocation4 + $0x1], 0 }
  0x1d   :  { %33 = vsyncpa [#allocation7], 0 }
  0x1e   :  { %35 = vsyncpa [#allocation7 + $0x1], 0 }
  0x1f   :  { %36 = vsyncpa [#allocation10], 0 }
  0x20   :  { %38 = vsyncpa [#allocation10 + $0x1], 0 }
  0x21   :  { %39 = vsyncpa [#allocation13], 0 }
  0x22   :  { %41 = vsyncpa [#allocation13 + $0x1], 0 }
  0x23   :  { %42 = vsyncpa [#allocation5], 0 }
  0x24   :  { %44 = vsyncpa [#allocation5 + $0x1], 0  ;;  %s3707_s29 = smov 0   ;;  %s3709_s2 = smov 0  }
  0x25   :  { %s3711_s6 = smov 0   ;;  %s3713_s30 = smov 0  }
  0x26   :  { %s3715_s7 = smov 0   ;;  %s3717_s3 = smov 0  }
  0x27   :  { %s3719_s26 = smov 0   ;;  %s3721_s1 = smov 0  }
  0x28   :  { %s3723_s8 = smov 0   ;;  %s3725_s27 = smov 0  }
  0x29   :  { %s3727_s4 = smov 0  }
  0x2a LB: > { %4377 = sst [smem:[#allocation20_spill]] %s3535_s2  ;;  %s3763_s28 = sadd.s32 4294967295, %s3571_s4   ;;  %s3571_s4 = sphi %s3727_s4, %s50_s4   ;;  %s3567_s27 = sphi %s3725_s27, %s4473_s27   ;;  %s3563_s8 = sphi %s3723_s8, %s4472_s8   ;;  %s3559_s1 = sphi %s3721_s1, %s4471_s1   ;;  %s3555_s26 = sphi %s3719_s26, %s4470_s26   ;;  %s3551_s3 = sphi %s3717_s3, %s4469_s3   ;;  %s3547_s7 = sphi %s3715_s7, %s4468_s7   ;;  %s3543_s30 = sphi %s3713_s30, %s4467_s30   ;;  %s3539_s6 = sphi %s3711_s6, %s4466_s6   ;;  %s3535_s2 = sphi %s3709_s2, %s4465_s2   ;;  %s3531_s29 = sphi %s3707_s29, %s4464_s29  }
  0x2b   : > { %4378 = sst [smem:[#allocation21_spill]] %s3539_s6  ;;  %s2851_s9 = sadd.s32 4294967294, %s3571_s4  }
  0x2c   : > { %4379 = sst [smem:[#allocation22_spill]] %s3543_s30  ;;  %p76_p0 = scmp.ne.s32.totalorder %s3551_s3, %s3547_s7 }
  0x2d   : > { %4380 = sst [smem:[#allocation23_spill]] %s3547_s7  ;;  %p77_p1 = scmp.eq.s32.totalorder %s3571_s4, 0 }
  0x2e   : > { %4381 = sst [smem:[#allocation24_spill]] %s3551_s3  ;;  %p82_p2 = scmp.ne.s32.totalorder %s3547_s7, %s3543_s30 }
  0x2f   : > { %4382 = sst [smem:[#allocation25_spill]] %s3555_s26  ;;  %p83_p3 = scmp.eq.s32.totalorder %s3763_s28, 0 }
  0x30   : > { %4383 = sst [smem:[#allocation26_spill]] %s3559_s1  ;;  %p78_p4 = por %p77_p1, %p76_p0 }
  0x31   : > { %4384 = sst [smem:[#allocation27_spill]] %s3563_s8  ;;  %p720_p5 = scmp.eq.s32.totalorder %s3763_s28, 3 }
  0x32   : > { %4385 = sst [smem:[#allocation28_spill]] %s3567_s27  ;;  %p3779_p6 = por %p83_p3, %p82_p2 }
  0x33   : > { %4386 = sst [smem:[#allocation29_spill]] %s3571_s4  ;;  %p726_p7 = scmp.eq.s32.totalorder %s2851_s9, 3 }
  0x34   : > { %p3783_p8 = por %p720_p5, %p76_p0  ;;  %p4334_p10 = scmp.lt.s32.totalorder %s3571_s4, 4 }
  0x35   : > { %p3787_p9 = por %p726_p7, %p82_p2  ;;  %s4333_s30 = sand.u32 1, %s3551_s3  }
  0x36   : > { %s4388_s5 = scalar_select %p3783_p8, 1, 0 }
  0x37   : > { %s4390_s0 = scalar_select %p3787_p9, 1, 0 }
  0x38   : > { %4389 = sst [smem:[#allocation30_spill]] %s4388_s5  ;;  %s3794_s1 = sshll.u32 %s3567_s27, 3 }
  0x39   : > { %4391 = sst [smem:[#allocation31_spill]] %s4390_s0  ;;  %s3798_s24 = sshll.u32 %s4333_s30, 3 }
  0x3a   : > { %p3802_p11 = pnand %p4334_p10, %p78_p4  ;;  %s4335_s0 = sand.u32 1, %s3571_s4  }
  0x3b   : > { %s4393_s22 = sld [smem:[#allocation41_spill]]  ;;  %s775_s20 = scalar_lea.vmem [#allocation6], %s3798_s24 }
  0x3c   : > { %s783_s30 = sshll.u32 %s775_s20, 4  ;;  %p2860_p12 = scmp.ge.s32.totalorder %s3571_s4, 1  ;;  %s784_s30 = int_to_ptr.vmem [resolvable:$true] %s783_s30 }
  0x3d   : > { %s3815_s18 = scalar_lea.sflag [#allocation7], %s4335_s0  ;;  %p980_p13 = scmp.lt.s32.totalorder %s3571_s4, 5 }
  0x3e   : > { %s59_s20 = sadd.s32 1, %s3563_s8  ;;  %p180_p4 = scmp.ne.s32.totalorder %s3539_s6, %s3535_s2 }
  0x3f   : > { %p3821_p0 = pnand %p2860_p12, %p980_p13  ;;  %p60_p2 = scmp.ge.s32.totalorder %s59_s20, 2 }
  0x40   : > { %p186_p5 = scmp.ne.s32.totalorder %s3535_s2, %s3531_s29  ;;  %s4396_s23 = sadd.s32 1, %s3567_s27 }
  0x41   : > { %s779_s21 = scalar_lea.hbm %s4393_s22, %s3794_s1  ;;  %s4475_s20 = smov (%p60_p2, %s59_s20), 0 }
  0x42   : > { %s781_s19 = sshll.u32 %s779_s21, 4  ;;  %s173_s21 = sadd.s32 1, %s3539_s6  ;;  %s782_s19 = int_to_ptr.hbm [resolvable:$true] %s781_s19 }
  0x43   : > { %3084 = dma.hbm_to_vmem [thread:$0]  (!%p3802_p11), %s782_s19, 128, %s784_s30, %s3815_s18  }
  0x44   : > { %4395 = sst [smem:[#allocation32_spill]] %s4475_s20  ;;  %s4477_s23 = smov (!%p60_p2, %s4396_s23), %s3567_s27 }
  0x45   : > { %s170_s19 = ssub.s32 %s3563_s8, %s4475_s20  ;;  %p3840_p7 = por %p180_p4, %p77_p1 }
  0x46   : > { %p64_p12 = scmp.ge.s32.totalorder %s4477_s23, 2  ;;  %p171_p13 = scmp.eq.s32.totalorder %s170_s19, 0 }
  0x47   : > { %p3846_p10 = por %p186_p5, %p83_p3  ;;  %s3851_s5 = sand.u32 1, %s3539_s6  }
  0x48   : > { %s4479_s23 = smov (%p64_p12, %s4477_s23), 0  ;;  %s4401_s19 = sld [smem:[#allocation44_spill]] }
  0x49   : > { %4399 = sst [smem:[#allocation33_spill]] %s4479_s23  ;;  %s66_s20 = ssub.s32 %s3567_s27, %s4479_s23 }
  0x4a   : > { %s3856_s0 = scalar_select %p171_p13, %s3539_s6, %s173_s21  }
  0x4b   : > { %p67_p1 = scmp.eq.s32.totalorder %s66_s20, 0  ;;  %s818_s12 = scalar_lea.vmem [#allocation9], %s3851_s5 }
  0x4c   : > { %4400 = sst [smem:[#allocation34_spill]] %s3856_s0  ;;  %s825_s11 = sshll.u32 %s818_s12, 4  ;;  %s826_s11 = int_to_ptr.vmem [resolvable:$true] %s825_s11 }
  0x4d   : > { %s4402_s10 = sadd.s32 1, %s3551_s3  ;;  %p4404_p3 = scmp.lt.s32.totalorder %s3571_s4, 4 }
  0x4e   : > { %s821_s14 = scalar_lea.hbm %s4401_s19, %s3563_s8  ;;  %s4406_s15 = sand.u32 1, %s3571_s4  }
  0x4f   : > { %s823_s13 = sshll.u32 %s821_s14, 4  ;;  %p3874_p2 = pnand %p4404_p3, %p3840_p7  ;;  %s824_s13 = int_to_ptr.hbm [resolvable:$true] %s823_s13 }
  0x50   : > { %s3868_s26 = scalar_select %p67_p1, %s3551_s3, %s4402_s10  }
  0x51   : > { %s816_s17 = scalar_lea.sflag [#allocation10], %s4406_s15  ;;  %s4407_s21 = sld [smem:[#allocation40_spill]] }
  0x52   : > { %4403 = sst [smem:[#allocation35_spill]] %s3868_s26  ;;  %s756_s19 = scalar_lea.vmem [#allocation3], %s3798_s24 }
  0x53   : > { %3090 = dma.hbm_to_vmem [thread:$0]  (!%p3874_p2), %s824_s13, 16, %s826_s11, %s816_s17  }
  0x54   : > { %s764_s30 = sshll.u32 %s756_s19, 4  ;;  %s4408_s27 = sand.u32 1, %s3551_s3   ;;  %s765_s30 = int_to_ptr.vmem [resolvable:$true] %s764_s30 }
  0x55   : > { %s753_s26 = scalar_lea.sflag [#allocation4], %s4408_s27  ;;  %s4409_s11 = sld [smem:[#allocation42_spill]] }
  0x56   : > { %s794_s12 = scalar_lea.vmem [#allocation8], %s3798_s24  ;;  %s4410_s27 = sld [smem:[#allocation49_spill]] }
  0x57   : > { %s760_s10 = scalar_lea.hbm %s4407_s21, %s3794_s1  ;;  %s802_s14 = sshll.u32 %s794_s12, 4  ;;  %s803_s14 = int_to_ptr.vmem [resolvable:$true] %s802_s14 }
  0x58   : > { %s762_s23 = sshll.u32 %s760_s10, 4  ;;  %s867_s6 = scalar_lea.vmem [#allocation11], %s3851_s5  ;;  %s763_s23 = int_to_ptr.hbm [resolvable:$true] %s762_s23 }
  0x59   : > { %3081 = dma.hbm_to_vmem [thread:$0]  (!%p3802_p11), %s763_s23, 128, %s765_s30, %s753_s26  }
  0x5a   : > { %s874_s26 = sshll.u32 %s867_s6, 4  ;;  %s4411_s16 = sld [smem:[#allocation56_spill]]  ;;  %s875_s26 = int_to_ptr.vmem [resolvable:$true] %s874_s26 }
  0x5b   : > { %s798_s13 = scalar_lea.hbm %s4409_s11, %s3794_s1  ;;  %s928_s15 = scalar_lea.vmem [#allocation12], %s3851_s5 }
  0x5c   : > { %s800_s21 = sshll.u32 %s798_s13, 4  ;;  %s870_s3 = scalar_lea.hbm %s4410_s27, %s3563_s8  ;;  %s801_s21 = int_to_ptr.hbm [resolvable:$true] %s800_s21 }
  0x5d   : > { %3087 = dma.hbm_to_vmem [thread:$0]  (!%p3802_p11), %s801_s21, 128, %s803_s14, %s3815_s18  }
  0x5e   : > { %s872_s23 = sshll.u32 %s870_s3, 4  ;;  %s935_s9 = sshll.u32 %s928_s15, 4  ;;  %s873_s23 = int_to_ptr.hbm [resolvable:$true] %s872_s23  ;;  %s936_s9 = int_to_ptr.vmem [resolvable:$true] %s935_s9 }
  0x5f   : > { %3093 = dma.hbm_to_vmem [thread:$0]  (!%p3874_p2), %s873_s23, 16, %s875_s26, %s816_s17  }
  0x60   : > { %s931_s0 = scalar_lea.hbm %s4411_s16, %s3563_s8  ;;  %s926_s18 = scalar_lea.sflag [#allocation13], %s3851_s5 }
  0x61   : > { %s933_s30 = sshll.u32 %s931_s0, 4  ;;  %984 = sbr.rel (%p3821_p0) target bundleno = 4260 (0x10a4), region = 120  ;;  %s934_s30 = int_to_ptr.hbm [resolvable:$true] %s933_s30 }
  0x62   : > { %3096 = dma.hbm_to_vmem [thread:$0]  (!%p3874_p2), %s934_s30, 16, %s936_s9, %s926_s18  }
  0x66   : > { %s3917_s6 = sand.u32 1, %s3547_s7  }
  0x67   : > { %4412 = sst [smem:[#allocation36_spill]] %s3917_s6  ;;  %s3920_s3 = sshll.u32 %s3917_s6, 3 }
  0x68   : > { %s987_s17 = scalar_lea.sflag [#allocation4], %s3917_s6 }
  0x69   : > { %3510 = dma.done.wait (%p3779_p6), %s987_s17, 128  }
  0x6a   : > { %3512 = vsyncadd (%p3779_p6), %s987_s17, 4294967168  ;;  %s996_s22 = sand.u32 1, %s3763_s28  }
  0x6b   : > { %s997_s5 = scalar_lea.sflag [#allocation7], %s996_s22 }
  0x6c   : > { %3514 = dma.done.wait (%p3779_p6), %s997_s5, 256  }
  0x6d   : > { %3516 = vsyncadd (%p3779_p6), %s997_s5, 4294967040  ;;  %s3935_s13 = sand.u32 1, %s3535_s2   ;;  %s1017_s14 = scalar_lea.sflag [#allocation10], %s996_s22 }
  0x6e   : > { %3518 = dma.done.wait (%p3846_p10), %s1017_s14, 32  }
  0x6f   : > { %3520 = vsyncadd (%p3846_p10), %s1017_s14, 4294967264  ;;  %s1035_s28 = scalar_lea.sflag [#allocation13], %s3935_s13 }
  0x70   : > { %3522 = dma.done.wait (%p3846_p10), %s1035_s28, 16  }
  0x71   : > { %3524 = vsyncadd (%p3846_p10), %s1035_s28, 4294967280  ;;  %s4413_s19 = sld [smem:[#allocation25_spill]]  ;;  %s1197_s1 = scalar_lea.vmem [#allocation14], %s3920_s3 }
  0x72   : > { %s4415_s15 = sld [smem:[#allocation45_spill]] }
  0x73   : > { %s4416_s22 = sld [smem:[#allocation46_spill]] }
  0x74   : > { %s4417_s26 = sld [smem:[#allocation47_spill]] }
  0x75   : > { %s4418_s25 = sld [smem:[#allocation48_spill]] }
  0x76   : > { %s4421_s14 = sld [smem:[#allocation52_spill]] }
  0x77   : > { %p1198_p6 = scmp.lt.s32.totalorder %s4413_s19, 1  ;;  %s4423_s7 = sld [smem:[#allocation53_spill]] }
  0x78   : > { %s4424_s10 = sld [smem:[#allocation54_spill]]  ;;  %p2885_p10 = scmp.ne.s32.totalorder %s4413_s19, 0 }
  0x79   : > { %s3952_s27 = scalar_select %p1198_p6, %s4413_s19, 1 }
  0x7a   : > { %s4429_s21 = sld [smem:[#allocation58_spill]] }
  0x7b   : > { %s3028_s0 = sshll.u32 %s3952_s27, 4  ;;  %s3031_s24 = sshll.u32 %s3952_s27, 5 }
  0x7c   : > { %s3962_s9 = scalar_lea.vmem %s4415_s15, %s3028_s0  ;;  %s3967_s5 = scalar_lea.vmem %s4416_s22, %s3028_s0 }
  0x7d   : > { %s3972_s23 = scalar_lea.vmem %s4417_s26, %s3028_s0  ;;  %s3978_s20 = scalar_lea.vmem %s4418_s25, %s3031_s24 }
  0x7e   : > { %s3991_s28 = scalar_lea.vmem %s4421_s14, %s3028_s0  ;;  %s3996_s2 = scalar_lea.vmem %s4423_s7, %s3028_s0 }
  0x7f   : > { %4422 = sst [smem:[#allocation37_spill]] %s3991_s28  ;;  %s4001_s4 = scalar_lea.vmem %s4424_s10, %s3028_s0 }
  0x80   : > { %4425 = sst [smem:[#allocation38_spill]] %s4001_s4  ;;  %s1252_s8 = scalar_lea.vmem %s4429_s21, %s3952_s27 }
  0x81   : > { %s4426_s15 = sld [smem:[#allocation55_spill]] }
  0x82   : > { %s4430_s6 = sld [smem:[#allocation59_spill]] }
  0x83   : > { %s4431_s10 = sld [smem:[#allocation60_spill]] }
  0x84   : > { %s4433_s16 = sld [smem:[#allocation62_spill]] }
  0x87   : > { %s4006_s18 = scalar_lea.vmem %s4426_s15, %s3031_s24  ;;  %s4432_s15 = sld [smem:[#allocation61_spill]] }
  0x88   : > { %4427 = sst [smem:[#allocation39_spill]] %s4006_s18  ;;  %s4019_s28 = scalar_lea.vmem %s4430_s6, %s3028_s0 }
  0x89   : > { %s1260_s4 = scalar_lea.vmem %s4431_s10, %s3952_s27  ;;  %1273 = sbr.rel (%p2885_p10) target bundleno = 144 (0x90), region = 148 }
  0x8a   : > { %s1268_s11 = scalar_lea.vmem %s4433_s16, %s3952_s27  ;;  %s4434_s6 = scalar_lea.vmem (!%p2885_p10), [#allocation3], %s3920_s3 }
  0x8d   : > { %s4028_s18 = scalar_lea.vmem %s4432_s15, %s3031_s24 }
  0x8e   : > { %v1274_v0 = vld [vmem:[%s4434_s6] sm:$0xff]  ;;  %vm1275_vm0 = vcmask 261120  }
  0x8f   : > { %1276 = vst.msk [vmem:[#allocation2] sm:$0xff] %vm1275_vm0, %v1274_v0 }
  0x90 PF: > { %vm1282_vm1 = vcmask 261120   ;;  %v3573_v3 = vmov 32.0   ;;  %v3039_v15 = vld [vmem:[%s3962_s9 + $0x8] sm:$0xff]  ;;  %v3038_v18 = vld [vmem:[%s3962_s9] sm:$0xff]  ;;  %s4435_s0 = sld [smem:[#allocation43_spill]]  ;;  %vm1424_vm6 = vcmask 130048  }
  0x91   : > { %3205 = vrcp.f32 %v3573_v3  ;;  %v3041_v16 = vld [vmem:[%s3967_s5 + $0x8] sm:$0xff]  ;;  %1363 = vmatpush.bf16.msra.mxu0 %v3039_v15  ;;  %v3040_v19 = vld [vmem:[%s3967_s5] sm:$0xff]  ;;  %s4437_s5 = scalar_lea.vmem [#allocation9], %s3935_s13  ;;  %s3575_s24 = smov 112   ;;  %vm1460_vm7 = vcmask 1043456   ;;  %vm1444_vm8 = vcmask 64512  }
  0x92   : > { %v3043_v17 = vld [vmem:[%s3972_s23 + $0x8] sm:$0xff]  ;;  %1390 = vmatpush.bf16.msra.mxu1 %v3041_v16  ;;  %v3042_v20 = vld [vmem:[%s3972_s23] sm:$0xff]  ;;  %s3574_s23 = smov 96   ;;  %s3576_s14 = smov 80  }
  0x93   : > { %1416 = vmatpush.bf16.msra.mxu2 %v3043_v17  ;;  %v3196_v33 = vld [vmem:[%s4437_s5] ss:$0 sm:$0xff]  ;;  %s4438_s7 = scalar_lea.vmem [#allocation6], %s3920_s3  ;;  %s4439_s26 = scalar_lea.vmem [#allocation11], %s3935_s13 }
  0x94   : > { %s4441_s25 = sld [smem:[#allocation50_spill]]  ;;  %s4446_s16 = scalar_lea.vmem [#allocation8], %s3920_s3 }
  0x95   : > { %1364 = vmatpush.bf16.msra.mxu0 %v3038_v18  ;;  %s4443_s15 = sld [smem:[#allocation51_spill]]  ;;  %s4448_s21 = scalar_lea.vmem [#allocation12], %s3935_s13 }
  0x96   : > { %v4038_v1 = vld [vmem:[#allocation2] sm:$0xff]  ;;  %1391 = vmatpush.bf16.msra.mxu1 %v3040_v19  ;;  %s4436_s9 = scalar_lea.vmem %s4435_s0, %s3952_s27  ;;  %s4445_s22 = sld [smem:[#allocation38_spill]] }
  0x97   : > { %v1283_v2 = vsel %vm1282_vm1, %v4038_v1, 0.0  ;;  %v3206_v4 = vpop.eup %3205  ;;  %1417 = vmatpush.bf16.msra.mxu2 %v3042_v20  ;;  %v3195_v30 = vld [vmem:[%s4436_s9] ss:$0 sm:$0xff]  ;;  %s4447_s6 = sld [smem:[#allocation39_spill]] }
  0x98   : > { %1284 = vadd.xlane.f32.xlu0 %v1283_v2  ;;  %v1287_v5 = vmul.f32 32.0, %v3206_v4  ;;  %vm1291_vm2 = vweird.f32 %v3206_v4  ;;  %s4449_s0 = sld [smem:[#allocation57_spill]] }
  0x9a   : > { %v1288_v6 = vsub.f32 1.0, %v1287_v5  ;;  %s4442_s10 = scalar_lea.vmem %s4441_s25, %s3952_s27 }
  0x9b   : > { %s4444_s17 = scalar_lea.vmem %s4443_s15, %s3952_s27 }
  0x9c   : > { %v1289_v7 = vmul.f32 %v3206_v4, %v1288_v6 }
  0x9e   : > { %v1290_v8 = vadd.f32 %v3206_v4, %v1289_v7 }
  0xa0   : > { %v4042_v9 = vsel %vm1291_vm2, %v3206_v4, %v1290_v8 }
 0x10b   : > { %v1285_v10 = vpop.xlane.xlu0 %1284 }
 0x10c   : > { %v1293_v11 = vmul.f32 %v4042_v9, %v1285_v10 }
 0x10e   : > { %v1294_v12 = vsub.f32 %v4038_v1, %v1293_v11 }
 0x110   : > { %v1295_v13 = vmul.f32 %v1294_v12, %v1294_v12 }
 0x112   : > { %v1296_v14 = vsel %vm1282_vm1, %v1295_v13, 0.0 }
 0x113   : > { %1297 = vadd.xlane.f32.xlu0 %v1296_v14  ;;  %v3044_v14 = vld [vmem:[%s3978_s20] sm:$0xff] }
 0x186   : > { %v1298_v21 = vpop.xlane.xlu0 %1297 }
 0x187   : > { %v1299_v22 = vmul.f32 %v1298_v21, %v4042_v9 }
 0x189   : > { %v1300_v23 = vadd.f32 1e-05, %v1299_v22 }
 0x18b   : > { %3207 = vrsqrt.f32 %v1300_v23  ;;  %vm1307_vm4 = vweird.f32 %v1300_v23 }
 0x191   : > { %v3208_v24 = vpop.eup %3207 }
 0x192   : > { %v1302_v25 = vmul.f32 %v3208_v24, %v1300_v23  ;;  %vm1308_vm3 = vweird.f32 %v3208_v24 }
 0x193   : > { %vm1309_vm5 = vmor %vm1307_vm4, %vm1308_vm3 }
 0x194   : > { %v1303_v26 = vmul.f32 %v3208_v24, %v1302_v25 }
 0x196   : > { %v1304_v27 = vmul.f32 0.5, %v1303_v26 }
 0x198   : > { %v1305_v28 = vsub.f32 1.5, %v1304_v27 }
 0x19a   : > { %v1306_v29 = vmul.f32 %v3208_v24, %v1305_v28 }
 0x19c   : > { %v1310_v31 = vsel %vm1309_vm5, %v3208_v24, %v1306_v29 }
 0x19d   : > { %v1311_v32 = vmul.f32 %v1310_v31, %v1294_v12 }
 0x19f   : > { %v1315_v34 = vmul.f32 %v3195_v30, %v1311_v32 }
 0x1a1   : > { %v1319_v35 = vadd.f32 %v3196_v33, %v1315_v34 }
 0x1a3   : > { %v1341_v36 = vpack.c.bf16 %v1319_v35, %v1319_v35 }
 0x1a5   : > { %2894 = vmatmul.msk.bf16.vlgmr.msra.gmra.mxu0 %vm1282_vm1, %v1341_v36  ;;  %2903 = vmatmul.msk.bf16.vlgmr.msra.gmra.mxu1 %vm1282_vm1, %v1341_v36 }
 0x1a6   : > { %2912 = vmatmul.msk.bf16.vlgmr.msra.gmra.mxu2 %vm1282_vm1, %v1341_v36 }
 0x222   : > { %v1366_v37 = vpop.f32.mrf.mxu0  ;;  %v1393_v38 = vpop.f32.mrf.mxu1 }
 0x223   : > { %v1370_v39 = vmul.f32 0.25, %v1366_v37  ;;  %v1397_v40 = vpack.c.bf16 %v1393_v38, %v1393_v38 }
 0x225   : > { %v1484_v41 = vunpack.c.l.b16 %v1397_v40  ;;  %v1429_v42 = vsel %vm1424_vm6, %v1397_v40, 0  ;;  %v1371_v43 = vpack.c.bf16 %v1370_v39, %v1370_v39 }
 0x226   : > { %1438 = vmatpush.bf16.xpose.msra.mxu3 %v1429_v42 }
 0x227   : > { %v1485_v44 = vpack.c.b16 %v1484_v41, %v1484_v41  ;;  %v1479_v49 = vunpack.c.l.b16 %v1371_v43 }
 0x229   : > { %v1419_v45 = vpop.f32.mrf.mxu2  ;;  %1590 = vrot.lane.b32.xlu0 %v1485_v44, %s3574_s23  ;;  %1486 = vrot.lane.b32.xlu2 %v1485_v44, %s3575_s24  ;;  %v1480_v51 = vpack.c.b16 %v1479_v49, %v1479_v49 }
 0x22a   : > { %v4067_v46 = vpack.c.bf16 %v1419_v45, %v1419_v45  ;;  %v1368_v47 = vpop.f32.mrf.mxu0  ;;  %v1395_v48 = vpop.f32.mrf.mxu1  ;;  %v3045_v45 = vld [vmem:[%s3978_s20 + $0x8] sm:$0xff] }
 0x22c   : > { %v1462_v50 = vsel %vm1460_vm7, %v4067_v46, 0  ;;  %v1520_v27 = vunpack.c.l.b16 %v4067_v46 }
 0x22d   : > { %1471 = vmatpush.bf16.msrb.mxu0 %v1462_v50  ;;  %2913 = vmatmul.msk.bf16.vlgmr.msra.gmra.mxu3 %vm1424_vm6, %v1371_v43 }
 0x22e   : > { %v1521_v28 = vpack.c.b16 %v1520_v27, %v1520_v27  ;;  %1560 = vmatpush.bf16.msrb.mxu3 %v3045_v45 }
 0x231   : > { %v1421_v52 = vpop.f32.mrf.mxu2  ;;  %1481 = vrot.lane.b32.xlu2 %v1480_v51, %s3575_s24  ;;  %1582 = vmatpush.bf16.msra.mxu0 %v3044_v14 }
 0x239   : > { %1670 = vrot.lane.b32.xlu2 %v1485_v44, %s3576_s14 }
 0x241   : > { %1668 = vrot.lane.b32.xlu2 %v1480_v51, %s3576_s14 }
 0x283   : > { %v1487_v53 = vpop.permute.xlu2 %1486 }
 0x284   : > { %v1492_v54 = vsel %vm1424_vm6, %v1487_v53, 0 }
 0x285   : > { %1501 = vmatpush.bf16.xpose.msrb.mxu1 %v1492_v54 }
 0x28b   : > { %v1482_v55 = vpop.permute.xlu2 %1481 }
 0x28c   : > { %2915 = vmatmul.msk.bf16.vlgmr.msrb.gmra.mxu1 %vm1424_vm6, %v1482_v55 }
 0x293   : > { %v1671_v6 = vpop.permute.xlu2 %1670 }
 0x294   : > { %v1676_v19 = vsel %vm1424_vm6, %v1671_v6, 0 }
 0x29b   : > { %v1591_v56 = vpop.permute.xlu0 %1590  ;;  %v1669_v7 = vpop.permute.xlu2 %1668 }
 0x29c   : > { %v1596_v57 = vsel %vm1424_vm6, %v1591_v56, 0 }
 0x29d   : > { %1605 = vmatpush.bf16.xpose.msra.mxu1 %v1596_v57 }
 0x2b0   : > { %v1440_v58 = vpop.f32.mrf.mxu3 }
 0x2b1   : > { %v1445_v59 = vsel %vm1444_vm8, %v1440_v58, -inf }
 0x2b2   : > { %1446 = vmax.xlane.f32.xlu1 %v1445_v59 }
 0x2b8   : > { %v1442_v60 = vpop.f32.mrf.mxu3 }
 0x2b9   : > { %v3046_v60 = vld [vmem:[%s3978_s20 + $0x10] sm:$0xff] }
 0x2ba   : > { %1661 = vmatpush.bf16.msra.mxu3 %v3046_v60 }
 0x309   : > { %v1503_v61 = vpop.f32.mrf.mxu1 }
 0x30a   : > { %v1507_v62 = vsel %vm1444_vm8, %v1503_v61, -inf }
 0x30b   : > { %1508 = vmax.xlane.f32.xlu2 %v1507_v62 }
 0x311   : > { %v1505_v63 = vpop.f32.mrf.mxu1 }
 0x325   : > { %v1447_v0 = vpop.xlane.xlu1 %1446 }
 0x326   : > { %v1448_v2 = vsub.f32 %v1440_v58, %v1447_v0 }
 0x328   : > { %v1449_v3 = vmul.f32 1.442695, %v1448_v2 }
 0x32a   : > { %3209 = vpow2.f32 %v1449_v3 }
 0x330   : > { %v3210_v4 = vpop.eup %3209 }
 0x331   : > { %v1451_v5 = vsel %vm1444_vm8, %v3210_v4, 0.0 }
 0x332   : > { %1452 = vadd.xlane.f32.xlu1 %v1451_v5 }
 0x34b   : > { %1588 = vrot.lane.b32.xlu1 %v1480_v51, %s3574_s23 }
 0x37e   : > { %v1509_v8 = vpop.xlane.xlu2 %1508 }
 0x37f   : > { %v1510_v10 = vsub.f32 %v1503_v61, %v1509_v8 }
 0x381   : > { %v1511_v11 = vmul.f32 1.442695, %v1510_v10  ;;  %v3047_v10 = vld [vmem:[%s3978_s20 + $0x18] sm:$0xff]  ;;  %s4440_s20 = sld [smem:[#allocation37_spill]] }
 0x383   : > { %3211 = vpow2.f32 %v1511_v11  ;;  %v1278_v11 = vld [vmem:[%s4438_s7] sm:$0xff] }
 0x389   : > { %v3212_v12 = vpop.eup %3211 }
 0x38a   : > { %v1513_v13 = vsel %vm1444_vm8, %v3212_v12, 0.0 }
 0x38b   : > { %1514 = vadd.xlane.f32.xlu2 %v1513_v13 }
 0x3a5   : > { %v1453_v15 = vpop.xlane.xlu1 %1452 }
 0x3a6   : > { %3213 = vrcp.f32 %v1453_v15 }
 0x3ac   : > { %v3214_v16 = vpop.eup %3213 }
 0x3ad   : > { %v1455_v17 = vmul.f32 %v3214_v16, %v3210_v4 }
 0x3af   : > { %v1456_v18 = vpack.c.bf16 %v1455_v17, %v1455_v17 }
 0x3b1   : > { %2914 = vmatmul.msk.bf16.vlgmr.msrb.gmra.mxu0 %vm1444_vm8, %v1456_v18 }
 0x3b2   : > { %1685 = vmatpush.bf16.xpose.msrb.mxu0 %v1676_v19 }
 0x3bd   : > { %v1589_v20 = vpop.permute.xlu1 %1588 }
 0x3be   : > { %2927 = vmatmul.msk.bf16.vlgmr.msra.gmra.mxu1 %vm1424_vm6, %v1589_v20 }
 0x3fe   : > { %v1515_v33 = vpop.xlane.xlu2 %1514 }
 0x42e   : > { %v1473_v21 = vpop.f32.mrf.mxu0 }
 0x42f   : > { %v1477_v22 = vpack.c.bf16 %v1473_v21, %v1473_v21  ;;  %v3197_v21 = vld [vmem:[%s4439_s26] ss:$0 sm:$0xff]  ;;  %s4454_s26 = sld [smem:[#allocation25_spill]] }
 0x431   : > { %2926 = vmatmul.msk.bf16.vlgmr.msra.gmra.mxu0 %vm1424_vm6, %v1477_v22 }
 0x435   : > { %p3023_p11 = scmp.ne.s32.totalorder %s4454_s26, 1 }
 0x436   : > { %v1475_v23 = vpop.f32.mrf.mxu0  ;;  %s4456_s25 = sld [smem:[#allocation64_spill]] (!%p3023_p11) }
 0x43b   : > { %v1607_v24 = vpop.f32.mrf.mxu1 }
 0x43c   : > { %v1611_v25 = vsel %vm1444_vm8, %v1607_v24, -inf }
 0x43d   : > { %1612 = vmax.xlane.f32.xlu0 %v1611_v25 }
 0x441   : > { %2934 = vmatmul.msk.bf16.vlgmr.msrb.gmra.mxu0 %vm1424_vm6, %v1669_v7 }
 0x443   : > { %v1609_v26 = vpop.f32.mrf.mxu1 }
 0x451   : > { %1522 = vrot.lane.b32.xlu0 %v1521_v28, %s3575_s24 }
 0x4ae   : > { %v4092_v29 = vpop.f32.mrf.mxu0 }
 0x4b0   : > { %v1613_v30 = vpop.xlane.xlu0 %1612 }
 0x4b1   : > { %v1614_v31 = vsub.f32 %v1607_v24, %v1613_v30 }
 0x4b3   : > { %v1615_v32 = vmul.f32 1.442695, %v1614_v31 }
 0x4b5   : > { %3215 = vpow2.f32 %v1615_v32  ;;  %v3051_v32 = vld [vmem:[%s3996_s2 + $0x8] sm:$0xff] }
 0x4b6   : > { %v1586_v34 = vpop.f32.mrf.mxu0  ;;  %3217 = vrcp.f32 %v1515_v33  ;;  %1883 = vmatpush.bf16.msra.mxu0 %v3051_v32 }
 0x4bb   : > { %v3216_v35 = vpop.eup %3215 }
 0x4bc   : > { %v1617_v36 = vsel %vm1444_vm8, %v3216_v35, 0.0  ;;  %v3218_v38 = vpop.eup %3217 }
 0x4bd   : > { %1618 = vadd.xlane.f32.xlu2 %v1617_v36  ;;  %v1517_v40 = vmul.f32 %v3218_v38, %v3212_v12  ;;  %v1785_v12 = vsel %vm1282_vm1, %v1278_v11, 0.0 }
 0x4be   : > { %v1687_v37 = vpop.f32.mrf.mxu0 }
 0x4bf   : > { %v1691_v39 = vsel %vm1444_vm8, %v1687_v37, -inf  ;;  %v1518_v44 = vpack.c.bf16 %v1517_v40, %v1517_v40 }
 0x4c0   : > { %1692 = vmax.xlane.f32.xlu1 %v1691_v39 }
 0x4c3   : > { %v1523_v41 = vpop.permute.xlu0 %1522 }
 0x4c4   : > { %v1528_v42 = vsel %vm1460_vm7, %v1523_v41, 0 }
 0x4c5   : > { %1537 = vmatpush.bf16.msrb.mxu2 %v1528_v42 }
 0x4c6   : > { %v1689_v43 = vpop.f32.mrf.mxu0 }
 0x4c8   : > { %2916 = vmatmul.msk.bf16.vlgmr.msrb.gmra.mxu2 %vm1444_vm8, %v1518_v44 }
 0x4d9   : > { %1623 = vrot.lane.b32.xlu1 %v1521_v28, %s3574_s23 }
 0x503   : > { %1786 = vadd.xlane.f32.xlu1 %v1785_v12 }
 0x530   : > { %v1619_v50 = vpop.xlane.xlu2 %1618 }
 0x533   : > { %v1693_v46 = vpop.xlane.xlu1 %1692 }
 0x534   : > { %v1694_v47 = vsub.f32 %v1687_v37, %v1693_v46 }
 0x536   : > { %v1695_v48 = vmul.f32 1.442695, %v1694_v47  ;;  %v3198_v47 = vld [vmem:[%s4442_s10] ss:$0 sm:$0xff] }
 0x538   : > { %3219 = vpow2.f32 %v1695_v48 }
 0x539   : > { %3221 = vrcp.f32 %v1619_v50  ;;  %v3199_v50 = vld [vmem:[%s4444_s17] ss:$0 sm:$0xff] }
 0x53e   : > { %v3220_v49 = vpop.eup %3219 }
 0x53f   : > { %v1697_v51 = vsel %vm1444_vm8, %v3220_v49, 0.0  ;;  %v3222_v52 = vpop.eup %3221 }
 0x540   : > { %1698 = vadd.xlane.f32.xlu2 %v1697_v51  ;;  %v1621_v53 = vmul.f32 %v3222_v52, %v3216_v35  ;;  %v3050_v35 = vld [vmem:[%s3996_s2] sm:$0xff] }
 0x541   : > { %1884 = vmatpush.bf16.msra.mxu0 %v3050_v35 }
 0x542   : > { %v1622_v58 = vpack.c.bf16 %v1621_v53, %v1621_v53 }
 0x54b   : > { %v1539_v54 = vpop.f32.mrf.mxu2  ;;  %v1624_v55 = vpop.permute.xlu1 %1623 }
 0x54c   : > { %v1543_v56 = vpack.c.bf16 %v1539_v54, %v1539_v54  ;;  %v1629_v57 = vsel %vm1460_vm7, %v1624_v55, 0  ;;  %v3049_v54 = vld [vmem:[%s4440_s20 + $0x8] sm:$0xff]  ;;  %v3048_v55 = vld [vmem:[%s4440_s20] sm:$0xff]  ;;  %s4455_s20 = sld [smem:[#allocation63_spill]] (!%p3023_p11) }
 0x54d   : > { %1638 = vmatpush.bf16.msra.mxu2 %v1629_v57 }
 0x54e   : > { %2921 = vmatmul.msk.bf16.vlgmr.msrb.gmra.mxu3 %vm1424_vm6, %v1543_v56 }
 0x54f   : > { %1852 = vmatpush.bf16.msrb.mxu3 %v3049_v54 }
 0x550   : > { %2928 = vmatmul.msk.bf16.vlgmr.msra.gmra.mxu2 %vm1444_vm8, %v1622_v58 }
 0x551   : > { %1741 = vmatpush.bf16.msrb.mxu2 %v3047_v10 }
 0x553   : > { %v1541_v59 = vpop.f32.mrf.mxu2  ;;  %1853 = vmatpush.bf16.msrb.mxu3 %v3048_v55 }
 0x558   : > { %1703 = vrot.lane.b32.xlu2 %v1521_v28, %s3576_s14 }
 0x576   : > { %v1787_v20 = vpop.xlane.xlu1 %1786 }
 0x577   : > { %v1788_v24 = vmul.f32 %v1787_v20, %v4042_v9  ;;  %v3053_v20 = vld [vmem:[%s4445_s22 + $0x8] sm:$0xff] }
 0x579   : > { %v1789_v27 = vsub.f32 %v1278_v11, %v1788_v24 }
 0x57b   : > { %v1790_v30 = vmul.f32 %v1789_v27, %v1789_v27 }
 0x57d   : > { %v1791_v31 = vsel %vm1282_vm1, %v1790_v30, 0.0 }
 0x5b3   : > { %v1699_v61 = vpop.xlane.xlu2 %1698 }
 0x5b4   : > { %3223 = vrcp.f32 %v1699_v61 }
 0x5ba   : > { %v3224_v62 = vpop.eup %3223 }
 0x5bb   : > { %v1701_v63 = vmul.f32 %v3224_v62, %v3220_v49  ;;  %v1704_v0 = vpop.permute.xlu2 %1703 }
 0x5bc   : > { %v1709_v2 = vsel %vm1460_vm7, %v1704_v0, 0 }
 0x5bd   : > { %v1702_v3 = vpack.c.bf16 %v1701_v63, %v1701_v63  ;;  %1718 = vmatpush.bf16.msrb.mxu1 %v1709_v2 }
 0x5c0   : > { %2935 = vmatmul.msk.bf16.vlgmr.msrb.gmra.mxu1 %vm1444_vm8, %v1702_v3 }
 0x5c1   : > { %1913 = vmatpush.bf16.msra.mxu1 %v3053_v20 }
 0x5d1   : > { %v1562_v4 = vpop.f32.mrf.mxu3 }
 0x5d2   : > { %v1585_v16 = vadd.f32 %v4092_v29, %v1562_v4 }
 0x5d3   : > { %v1640_v5 = vpop.f32.mrf.mxu2 }
 0x5d4   : > { %v1644_v6 = vpack.c.bf16 %v1640_v5, %v1640_v5 }
 0x5d6   : > { %2933 = vmatmul.msk.bf16.vlgmr.msra.gmra.mxu3 %vm1424_vm6, %v1644_v6 }
 0x5d9   : > { %v1564_v7 = vpop.f32.mrf.mxu3 }
 0x5db   : > { %v1642_v8 = vpop.f32.mrf.mxu2 }
 0x63d   : > { %v1720_v13 = vpop.f32.mrf.mxu1 }
 0x63e   : > { %v1724_v14 = vpack.c.bf16 %v1720_v13, %v1720_v13 }
 0x640   : > { %2940 = vmatmul.msk.bf16.vlgmr.msrb.gmra.mxu2 %vm1424_vm6, %v1724_v14 }
 0x645   : > { %v1722_v15 = vpop.f32.mrf.mxu1 }
 0x659   : > { %v1663_v17 = vpop.f32.mrf.mxu3 }
 0x65a   : > { %v1667_v18 = vadd.f32 %v1663_v17, %v1585_v16 }
 0x661   : > { %v1665_v19 = vpop.f32.mrf.mxu3 }
 0x6c3   : > { %v1743_v22 = vpop.f32.mrf.mxu2 }
 0x6c4   : > { %v1747_v23 = vadd.f32 %v1743_v22, %v1667_v18  ;;  %v3052_v22 = vld [vmem:[%s4445_s22] sm:$0xff] }
 0x6c5   : > { %1914 = vmatpush.bf16.msra.mxu1 %v3052_v22 }
 0x6c6   : > { %v1751_v25 = vadd.f32 %v3197_v21, %v1747_v23  ;;  %v1279_v23 = vld [vmem:[%s4446_s16] sm:$0xff] }
 0x6c7   : > { %v1891_v24 = vpack.c.bf16 %v1279_v23, %v1279_v23 }
 0x6c8   : > { %v4119_v26 = vadd.f32 %v1751_v25, %v4038_v1 }
 0x6c9   : > { %2967 = vmatmul.msk.bf16.vlgmr.msra.gmra.mxu1 %vm1282_vm1, %v1891_v24 }
 0x6ca   : > { %v1755_v28 = vsel %vm1282_vm1, %v4119_v26, 0.0 }
 0x6cb   : > { %v1745_v29 = vpop.f32.mrf.mxu2  ;;  %1756 = vadd.xlane.f32.xlu0 %v1755_v28 }
 0x6d3   : > { %1792 = vadd.xlane.f32.xlu0 %v1791_v31 }
 0x73e   : > { %v1757_v33 = vpop.xlane.xlu0 %1756 }
 0x73f   : > { %v1758_v34 = vmul.f32 %v1757_v33, %v4042_v9 }
 0x741   : > { %v1759_v36 = vsub.f32 %v4119_v26, %v1758_v34 }
 0x743   : > { %v1760_v1 = vmul.f32 %v1759_v36, %v1759_v36 }
 0x745   : > { %v1761_v37 = vsel %vm1282_vm1, %v1760_v1, 0.0 }
 0x746   : > { %1762 = vadd.xlane.f32.xlu2 %v1761_v37  ;;  %v1793_v38 = vpop.xlane.xlu0 %1792  ;;  %v1916_v1 = vpop.f32.mrf.mxu1 }
 0x747   : > { %v1794_v39 = vmul.f32 %v1793_v38, %v4042_v9  ;;  %v1920_v37 = vpack.c.bf16 %v1916_v1, %v1916_v1 }
 0x749   : > { %v1795_v40 = vadd.f32 1e-05, %v1794_v39  ;;  %v1956_v38 = vsel %vm1460_vm7, %v1920_v37, 0 }
 0x74a   : > { %1965 = vmatpush.bf16.msra.mxu3 %v1956_v38 }
 0x74b   : > { %3225 = vrsqrt.f32 %v1795_v40  ;;  %vm1802_vm9 = vweird.f32 %v1795_v40 }
 0x74e   : > { %v1918_v39 = vpop.f32.mrf.mxu1 }
 0x751   : > { %v3226_v41 = vpop.eup %3225 }
 0x752   : > { %v1797_v42 = vmul.f32 %v3226_v41, %v1795_v40  ;;  %vm1803_vm10 = vweird.f32 %v3226_v41  ;;  %v3054_v40 = vld [vmem:[%s4447_s6] sm:$0xff] }
 0x753   : > { %vm1804_vm11 = vmor %vm1802_vm9, %vm1803_vm10 }
 0x754   : > { %v1798_v43 = vmul.f32 %v3226_v41, %v1797_v42 }
 0x756   : > { %v1799_v44 = vmul.f32 0.5, %v1798_v43 }
 0x758   : > { %v1800_v45 = vsub.f32 1.5, %v1799_v44 }
 0x75a   : > { %v1801_v46 = vmul.f32 %v3226_v41, %v1800_v45 }
 0x75c   : > { %v1805_v48 = vsel %vm1804_vm11, %v3226_v41, %v1801_v46 }
 0x75d   : > { %v1806_v49 = vmul.f32 %v1805_v48, %v1789_v27 }
 0x75f   : > { %v1807_v51 = vmul.f32 %v3198_v47, %v1806_v49 }
 0x761   : > { %v1808_v52 = vadd.f32 %v3199_v50, %v1807_v51 }
 0x763   : > { %v1861_v53 = vpack.c.bf16 %v1808_v52, %v1808_v52 }
 0x765   : > { %2958 = vmatmul.msk.bf16.vlgmr.msra.gmra.mxu0 %vm1282_vm1, %v1861_v53 }
 0x7b9   : > { %v1763_v56 = vpop.xlane.xlu2 %1762 }
 0x7ba   : > { %v1764_v57 = vmul.f32 %v1763_v56, %v4042_v9 }
 0x7bc   : > { %v1765_v58 = vadd.f32 1e-05, %v1764_v57 }
 0x7be   : > { %3227 = vrsqrt.f32 %v1765_v58  ;;  %vm1772_vm13 = vweird.f32 %v1765_v58 }
 0x7c4   : > { %v3228_v59 = vpop.eup %3227 }
 0x7c5   : > { %v1767_v60 = vmul.f32 %v3228_v59, %v1765_v58  ;;  %vm1773_vm12 = vweird.f32 %v3228_v59 }
 0x7c6   : > { %vm1774_vm14 = vmor %vm1772_vm13, %vm1773_vm12 }
 0x7c7   : > { %v1768_v61 = vmul.f32 %v3228_v59, %v1767_v60 }
 0x7c9   : > { %v1769_v62 = vmul.f32 0.5, %v1768_v61 }
 0x7cb   : > { %v1770_v63 = vsub.f32 1.5, %v1769_v62 }
 0x7cd   : > { %v1771_v0 = vmul.f32 %v3228_v59, %v1770_v63 }
 0x7cf   : > { %v1775_v2 = vsel %vm1774_vm14, %v3228_v59, %v1771_v0  ;;  %v2014_v59 = vunpack.c.l.b16 %v1920_v37 }
 0x7d0   : > { %v1776_v3 = vmul.f32 %v1775_v2, %v1759_v36 }
 0x7d1   : > { %v2015_v60 = vpack.c.b16 %v2014_v59, %v2014_v59 }
 0x7d2   : > { %v1780_v4 = vmul.f32 %v3198_v47, %v1776_v3 }
 0x7d4   : > { %v1784_v5 = vadd.f32 %v3199_v50, %v1780_v4 }
 0x7d6   : > { %v1830_v6 = vpack.c.bf16 %v1784_v5, %v1784_v5 }
 0x7d8   : > { %2949 = vmatmul.msk.bf16.vlgmr.msrb.gmra.mxu3 %vm1282_vm1, %v1830_v6 }
 0x7d9   : > { %2076 = vmatpush.bf16.msrb.mxu3 %v3054_v40 }
 0x7e2   : > { %v1886_v7 = vpop.f32.mrf.mxu0 }
 0x7e3   : > { %v1890_v8 = vpack.c.bf16 %v1886_v7, %v1886_v7 }
 0x7e5   : > { %v1925_v10 = vsel %vm1424_vm6, %v1890_v8, 0  ;;  %v1978_v11 = vunpack.c.l.b16 %v1890_v8 }
 0x7e6   : > { %1934 = vmatpush.bf16.xpose.msra.mxu2 %v1925_v10 }
 0x7e7   : > { %v1979_v12 = vpack.c.b16 %v1978_v11, %v1978_v11 }
 0x7e9   : > { %2084 = vrot.lane.b32.xlu2 %v1979_v12, %s3574_s23 }
 0x7ea   : > { %v1888_v13 = vpop.f32.mrf.mxu0 }
 0x843   : > { %v2085_v33 = vpop.permute.xlu2 %2084 }
 0x844   : > { %v2090_v36 = vsel %vm1424_vm6, %v2085_v33, 0  ;;  %v3056_v33 = vld [vmem:[%s4447_s6 + $0x10] sm:$0xff] }
 0x85b   : > { %v1855_v14 = vpop.f32.mrf.mxu3 }
 0x85c   : > { %v1859_v15 = vmul.f32 0.25, %v1855_v14 }
 0x85e   : > { %v1860_v16 = vpack.c.bf16 %v1859_v15, %v1859_v15 }
 0x860   : > { %2968 = vmatmul.msk.bf16.vlgmr.msra.gmra.mxu2 %vm1424_vm6, %v1860_v16  ;;  %v1973_v25 = vunpack.c.l.b16 %v1860_v16 }
 0x862   : > { %v1974_v27 = vpack.c.b16 %v1973_v25, %v1973_v25 }
 0x863   : > { %v1857_v17 = vpop.f32.mrf.mxu3 }
 0x8e3   : > { %v1936_v18 = vpop.f32.mrf.mxu2 }
 0x8e4   : > { %v1940_v19 = vsel %vm1444_vm8, %v1936_v18, -inf }
 0x8e5   : > { %1941 = vmax.xlane.f32.xlu0 %v1940_v19 }
 0x8eb   : > { %v1938_v21 = vpop.f32.mrf.mxu2 }
 0x8f9   : > { %1980 = vrot.lane.b32.xlu0 %v1979_v12, %s3575_s24 }
 0x901   : > { %2164 = vrot.lane.b32.xlu0 %v1979_v12, %s3576_s14 }
 0x909   : > { %2162 = vrot.lane.b32.xlu0 %v1974_v27, %s3576_s14 }
 0x958   : > { %v1942_v28 = vpop.xlane.xlu0 %1941 }
 0x959   : > { %v1943_v29 = vsub.f32 %v1936_v18, %v1942_v28 }
 0x95b   : > { %v1944_v30 = vmul.f32 1.442695, %v1943_v29 }
 0x95d   : > { %3229 = vpow2.f32 %v1944_v30 }
 0x963   : > { %v3230_v31 = vpop.eup %3229 }
 0x964   : > { %v1946_v32 = vsel %vm1444_vm8, %v3230_v31, 0.0 }
 0x965   : > { %1947 = vadd.xlane.f32.xlu1 %v1946_v32  ;;  %v3055_v32 = vld [vmem:[%s4447_s6 + $0x8] sm:$0xff] }
 0x966   : > { %2054 = vmatpush.bf16.msrb.mxu2 %v3055_v32 }
 0x96a   : > { %2155 = vmatpush.bf16.msra.mxu2 %v3056_v33 }
 0x96b   : > { %v1981_v34 = vpop.permute.xlu0 %1980 }
 0x96c   : > { %v1986_v35 = vsel %vm1424_vm6, %v1981_v34, 0 }
 0x96d   : > { %1995 = vmatpush.bf16.xpose.msrb.mxu0 %v1986_v35 }
 0x973   : > { %v2165_v44 = vpop.permute.xlu0 %2164 }
 0x974   : > { %v2170_v46 = vsel %vm1424_vm6, %v2165_v44, 0 }
 0x975   : > { %2099 = vmatpush.bf16.xpose.msra.mxu0 %v2090_v36 }
 0x97b   : > { %v2163_v55 = vpop.permute.xlu0 %2162 }
 0x97e   : > { %1975 = vrot.lane.b32.xlu1 %v1974_v27, %s3575_s24 }
 0x986   : > { %2082 = vrot.lane.b32.xlu1 %v1974_v27, %s3574_s23 }
 0x9d8   : > { %v1948_v41 = vpop.xlane.xlu1 %1947 }
 0x9d9   : > { %3231 = vrcp.f32 %v1948_v41 }
 0x9df   : > { %v3232_v42 = vpop.eup %3231 }
 0x9e0   : > { %v1950_v43 = vmul.f32 %v3232_v42, %v3230_v31 }
 0x9e2   : > { %v1951_v45 = vpack.c.bf16 %v1950_v43, %v1950_v43 }
 0x9e4   : > { %2969 = vmatmul.msk.bf16.vlgmr.msra.gmra.mxu3 %vm1444_vm8, %v1951_v45  ;;  %v3057_v45 = vld [vmem:[%s4447_s6 + $0x18] sm:$0xff] }
 0x9e5   : > { %2179 = vmatpush.bf16.xpose.msra.mxu3 %v2170_v46 }
 0x9f0   : > { %v1976_v47 = vpop.permute.xlu1 %1975 }
 0x9f1   : > { %2970 = vmatmul.msk.bf16.vlgmr.msrb.gmra.mxu0 %vm1424_vm6, %v1976_v47 }
 0x9f8   : > { %v2083_v48 = vpop.permute.xlu1 %2082 }
 0xa01   : > { %2982 = vmatmul.msk.bf16.vlgmr.msra.gmra.mxu0 %vm1424_vm6, %v2083_v48 }
 0xa67   : > { %v1967_v49 = vpop.f32.mrf.mxu3 }
 0xa68   : > { %v1971_v50 = vpack.c.bf16 %v1967_v49, %v1967_v49 }
 0xa6a   : > { %2981 = vmatmul.msk.bf16.vlgmr.msrb.gmra.mxu3 %vm1424_vm6, %v1971_v50 }
 0xa6e   : > { %v1997_v51 = vpop.f32.mrf.mxu0 }
 0xa6f   : > { %v1969_v52 = vpop.f32.mrf.mxu3  ;;  %v2001_v53 = vsel %vm1444_vm8, %v1997_v51, -inf }
 0xa70   : > { %2002 = vmax.xlane.f32.xlu2 %v2001_v53 }
 0xa76   : > { %v1999_v54 = vpop.f32.mrf.mxu0 }
 0xa7a   : > { %2989 = vmatmul.msk.bf16.vlgmr.msra.gmra.mxu3 %vm1424_vm6, %v2163_v55  ;;  %v3200_v55 = vld [vmem:[%s4448_s21] ss:$0 sm:$0xff] }
 0xa7e   : > { %v2101_v56 = vpop.f32.mrf.mxu0 }
 0xa7f   : > { %v2105_v57 = vsel %vm1444_vm8, %v2101_v56, -inf }
 0xa80   : > { %2106 = vmax.xlane.f32.xlu1 %v2105_v57 }
 0xa86   : > { %v2103_v58 = vpop.f32.mrf.mxu0 }
 0xa99   : > { %2016 = vrot.lane.b32.xlu1 %v2015_v60, %s3575_s24 }
 0xae3   : > { %v2003_v61 = vpop.xlane.xlu2 %2002 }
 0xae4   : > { %v2004_v62 = vsub.f32 %v1997_v51, %v2003_v61 }
 0xae6   : > { %v2005_v63 = vmul.f32 1.442695, %v2004_v62 }
 0xae8   : > { %3233 = vpow2.f32 %v2005_v63 }
 0xaed   : > { %v4173_v0 = vpop.f32.mrf.mxu3 }
 0xaee   : > { %v3234_v2 = vpop.eup %3233 }
 0xaef   : > { %v2007_v3 = vsel %vm1444_vm8, %v3234_v2, 0.0 }
 0xaf0   : > { %2008 = vadd.xlane.f32.xlu2 %v2007_v3 }
 0xaf3   : > { %v2107_v4 = vpop.xlane.xlu1 %2106 }
 0xaf4   : > { %v2108_v5 = vsub.f32 %v2101_v56, %v2107_v4  ;;  %v3059_v4 = vld [vmem:[%s4019_s28 + $0x8] sm:$0xff] }
 0xaf5   : > { %v2080_v6 = vpop.f32.mrf.mxu3 }
 0xaf6   : > { %v2109_v7 = vmul.f32 1.442695, %v2108_v5  ;;  %v3058_v5 = vld [vmem:[%s4019_s28] sm:$0xff]  ;;  %s4450_s28 = scalar_lea.vmem %s4449_s0, %s3952_s27 }
 0xaf8   : > { %3235 = vpow2.f32 %v2109_v7 }
 0xafd   : > { %v2181_v8 = vpop.f32.mrf.mxu3 }
 0xafe   : > { %v2185_v10 = vsel %vm1444_vm8, %v2181_v8, -inf  ;;  %v3236_v11 = vpop.eup %3235 }
 0xaff   : > { %2186 = vmax.xlane.f32.xlu0 %v2185_v10  ;;  %v2111_v13 = vsel %vm1444_vm8, %v3236_v11, 0.0 }
 0xb05   : > { %v2183_v12 = vpop.f32.mrf.mxu3 }
 0xb07   : > { %2112 = vadd.xlane.f32.xlu0 %v2111_v13 }
 0xb08   : > { %2117 = vrot.lane.b32.xlu2 %v2015_v60, %s3574_s23 }
 0xb0b   : > { %v2017_v14 = vpop.permute.xlu1 %2016 }
 0xb0c   : > { %v2022_v15 = vsel %vm1460_vm7, %v2017_v14, 0 }
 0xb0d   : > { %2031 = vmatpush.bf16.msrb.mxu1 %v2022_v15  ;;  %v3201_v15 = vld [vmem:[%s4450_s28] ss:$0 sm:$0xff] }
 0xb63   : > { %v2009_v16 = vpop.xlane.xlu2 %2008 }
 0xb64   : > { %3237 = vrcp.f32 %v2009_v16 }
 0xb6a   : > { %v3238_v17 = vpop.eup %3237 }
 0xb6b   : > { %v2011_v18 = vmul.f32 %v3238_v17, %v3234_v2  ;;  %v2118_v19 = vpop.permute.xlu2 %2117 }
 0xb6c   : > { %v2123_v20 = vsel %vm1460_vm7, %v2118_v19, 0 }
 0xb6d   : > { %v2012_v21 = vpack.c.bf16 %v2011_v18, %v2011_v18  ;;  %2132 = vmatpush.bf16.msra.mxu1 %v2123_v20  ;;  %v3202_v18 = vld [vmem:[%s1252_s8] ss:$0 sm:$0xff] }
 0xb6f   : > { %2971 = vmatmul.msk.bf16.vlgmr.msrb.gmra.mxu1 %vm1444_vm8, %v2012_v21 }
 0xb71   : > { %2235 = vmatpush.bf16.msrb.mxu1 %v3057_v45 }
 0xb72   : > { %v2187_v22 = vpop.xlane.xlu0 %2186 }
 0xb73   : > { %v2188_v23 = vsub.f32 %v2181_v8, %v2187_v22  ;;  %v3203_v22 = vld [vmem:[%s1260_s4] ss:$0 sm:$0xff] }
 0xb75   : > { %v2189_v24 = vmul.f32 1.442695, %v2188_v23 }
 0xb77   : > { %3239 = vpow2.f32 %v2189_v24 }
 0xb7a   : > { %v2113_v25 = vpop.xlane.xlu0 %2112 }
 0xb7b   : > { %3241 = vrcp.f32 %v2113_v25 }
 0xb7d   : > { %v3240_v27 = vpop.eup %3239 }
 0xb7e   : > { %v2191_v28 = vsel %vm1444_vm8, %v3240_v27, 0.0 }
 0xb7f   : > { %2192 = vadd.xlane.f32.xlu0 %v2191_v28 }
 0xb81   : > { %v3242_v29 = vpop.eup %3241 }
 0xb82   : > { %v2115_v30 = vmul.f32 %v3242_v29, %v3236_v11 }
 0xb84   : > { %v2116_v31 = vpack.c.bf16 %v2115_v30, %v2115_v30  ;;  %v3063_v30 = vld [vmem:[%s4028_s18 + $0x18] sm:$0xff] }
 0xb85   : > { %2401 = vmatpush.bf16.msrb.mxu3 %v3063_v30 }
 0xb86   : > { %2983 = vmatmul.msk.bf16.vlgmr.msra.gmra.mxu1 %vm1444_vm8, %v2116_v31 }
 0xb93   : > { %2197 = vrot.lane.b32.xlu0 %v2015_v60, %s3576_s14 }
 0xbec   : > { %v2033_v34 = vpop.f32.mrf.mxu1 }
 0xbed   : > { %v2037_v35 = vpack.c.bf16 %v2033_v34, %v2033_v34 }
 0xbef   : > { %2976 = vmatmul.msk.bf16.vlgmr.msrb.gmra.mxu2 %vm1424_vm6, %v2037_v35  ;;  %v3062_v35 = vld [vmem:[%s4028_s18 + $0x10] sm:$0xff] }
 0xbf0   : > { %2309 = vmatpush.bf16.msrb.mxu2 %v3059_v4  ;;  %2402 = vmatpush.bf16.msrb.mxu3 %v3062_v35 }
 0xbf2   : > { %v2193_v1 = vpop.xlane.xlu0 %2192 }
 0xbf3   : > { %3243 = vrcp.f32 %v2193_v1 }
 0xbf4   : > { %v2035_v36 = vpop.f32.mrf.mxu1  ;;  %2310 = vmatpush.bf16.msrb.mxu2 %v3058_v5 }
 0xbf9   : > { %v3244_v37 = vpop.eup %3243 }
 0xbfa   : > { %v2195_v39 = vmul.f32 %v3244_v37, %v3240_v27 }
 0xbfc   : > { %v2196_v43 = vpack.c.bf16 %v2195_v39, %v2195_v39  ;;  %v3061_v39 = vld [vmem:[%s4028_s18 + $0x8] sm:$0xff] }
 0xbfd   : > { %2403 = vmatpush.bf16.msrb.mxu3 %v3061_v39 }
 0xc03   : > { %v2134_v38 = vpop.f32.mrf.mxu1 }
 0xc04   : > { %v2138_v40 = vpack.c.bf16 %v2134_v38, %v2134_v38 }
 0xc05   : > { %v2198_v41 = vpop.permute.xlu0 %2197 }
 0xc06   : > { %v2203_v42 = vsel %vm1460_vm7, %v2198_v41, 0  ;;  %2988 = vmatmul.msk.bf16.vlgmr.msra.gmra.mxu2 %vm1424_vm6, %v2138_v40  ;;  %vm2393_vm7 = vcmask 523264  }
 0xc07   : > { %2212 = vmatpush.bf16.msrb.mxu0 %v2203_v42 }
 0xc0a   : > { %2990 = vmatmul.msk.bf16.vlgmr.msrb.gmra.mxu0 %vm1444_vm8, %v2196_v43  ;;  %v3060_v43 = vld [vmem:[%s4028_s18] sm:$0xff] }
 0xc0b   : > { %v2136_v44 = vpop.f32.mrf.mxu1  ;;  %2404 = vmatpush.bf16.msrb.mxu3 %v3060_v43 }
 0xc72   : > { %v2056_v46 = vpop.f32.mrf.mxu2 }
 0xc73   : > { %v2079_v49 = vadd.f32 %v4173_v0, %v2056_v46 }
 0xc7a   : > { %v2058_v47 = vpop.f32.mrf.mxu2 }
 0xc87   : > { %v2214_v48 = vpop.f32.mrf.mxu0 }
 0xc88   : > { %v2218_v50 = vpack.c.bf16 %v2214_v48, %v2214_v48 }
 0xc89   : > { %v2157_v51 = vpop.f32.mrf.mxu2 }
 0xc8a   : > { %v2161_v52 = vadd.f32 %v2157_v51, %v2079_v49  ;;  %2995 = vmatmul.msk.bf16.vlgmr.msrb.gmra.mxu1 %vm1424_vm6, %v2218_v50 }
 0xc8f   : > { %v2216_v53 = vpop.f32.mrf.mxu0 }
 0xc91   : > { %v2159_v54 = vpop.f32.mrf.mxu2 }
 0xd07   : > { %v2237_v56 = vpop.f32.mrf.mxu1 }
 0xd08   : > { %v2241_v57 = vadd.f32 %v2237_v56, %v2161_v52 }
 0xd0a   : > { %v2245_v58 = vadd.f32 %v3200_v55, %v2241_v57 }
 0xd0c   : > { %v4197_v59 = vadd.f32 %v2245_v58, %v4119_v26 }
 0xd0e   : > { %v2249_v60 = vsel %vm1282_vm1, %v4197_v59, 0.0 }
 0xd0f   : > { %2250 = vadd.xlane.f32.xlu1 %v2249_v60  ;;  %v2239_v61 = vpop.f32.mrf.mxu1 }
 0xd82   : > { %v2251_v62 = vpop.xlane.xlu1 %2250 }
 0xd83   : > { %v2252_v63 = vmul.f32 %v2251_v62, %v4042_v9 }
 0xd85   : > { %v2253_v0 = vsub.f32 %v4197_v59, %v2252_v63 }
 0xd87   : > { %v2254_v2 = vmul.f32 %v2253_v0, %v2253_v0 }
 0xd89   : > { %v2255_v3 = vsel %vm1282_vm1, %v2254_v2, 0.0 }
 0xd8a   : > { %2256 = vadd.xlane.f32.xlu2 %v2255_v3 }
 0xdfd   : > { %v2257_v26 = vpop.xlane.xlu2 %2256 }
 0xdfe   : > { %v2258_v6 = vmul.f32 %v2257_v26, %v4042_v9 }
 0xe00   : > { %v2259_v7 = vadd.f32 1e-05, %v2258_v6 }
 0xe02   : > { %3245 = vrsqrt.f32 %v2259_v7  ;;  %vm2266_vm0 = vweird.f32 %v2259_v7 }
 0xe08   : > { %v3246_v8 = vpop.eup %3245 }
 0xe09   : > { %v2261_v10 = vmul.f32 %v3246_v8, %v2259_v7  ;;  %vm2267_vm15 = vweird.f32 %v3246_v8  ;;  %v3204_v7 = vld [vmem:[%s1268_s11] ss:$0 sm:$0xff] }
 0xe0a   : > { %vm2268_vm2 = vmor %vm2266_vm0, %vm2267_vm15 }
 0xe0b   : > { %v2262_v11 = vmul.f32 %v3246_v8, %v2261_v10 }
 0xe0d   : > { %v2263_v12 = vmul.f32 0.5, %v2262_v11 }
 0xe0f   : > { %v2264_v13 = vsub.f32 1.5, %v2263_v12 }
 0xe11   : > { %v2265_v14 = vmul.f32 %v3246_v8, %v2264_v13 }
 0xe13   : > { %v2269_v16 = vsel %vm2268_vm2, %v3246_v8, %v2265_v14 }
 0xe14   : > { %v2270_v17 = vmul.f32 %v2269_v16, %v2253_v0 }
 0xe16   : > { %v2274_v19 = vmul.f32 %v3201_v15, %v2270_v17 }
 0xe18   : > { %v2278_v20 = vadd.f32 %v3202_v18, %v2274_v19 }
 0xe1a   : > { %v2283_v21 = vpack.c.bf16 %v2278_v20, %v2278_v20 }
 0xe1c   : > { %3004 = vmatmul.msk.bf16.vlgmr.msrb.gmra.mxu2 %vm1282_vm1, %v2283_v21 }
 0xe9f   : > { %v2312_v23 = vpop.f32.mrf.mxu2 }
 0xea0   : > { %v2313_v24 = vadd.f32 %v3203_v22, %v2312_v23 }
 0xea2   : > { %v2317_v25 = vmul.f32 0.70710677, %v2313_v24  ;;  %v2316_v4 = vmul.f32 0.5, %v2313_v24 }
 0xea4   : > { %v2318_v27 = vmul.f32 %v2317_v25, %v2317_v25 }
 0xea6   : > { %v2319_v28 = vmin.f32 %v2318_v27, 16.0 }
 0xea7   : > { %v2314_v29 = vpop.f32.mrf.mxu2 }
 0xea8   : > { %v2320_v31 = vmul.f32 2.1237322e-06, %v2319_v28  ;;  %v2331_v32 = vmul.f32 3.8918573e-05, %v2319_v28 }
 0xeaa   : > { %v2321_v33 = vadd.f32 0.00028619796, %v2320_v31  ;;  %v2332_v34 = vadd.f32 0.001143296, %v2331_v32 }
 0xeac   : > { %v2322_v36 = vmul.f32 %v2321_v33, %v2319_v28  ;;  %v2333_v1 = vmul.f32 %v2332_v34, %v2319_v28 }
 0xeae   : > { %v2334_v37 = vadd.f32 0.014752088, %v2333_v1  ;;  %v2323_v38 = vadd.f32 0.0036580483, %v2322_v36 }
 0xeb0   : > { %v2335_v40 = vmul.f32 %v2334_v37, %v2319_v28  ;;  %v2324_v42 = vmul.f32 %v2323_v38, %v2319_v28 }
 0xeb2   : > { %v2336_v41 = vadd.f32 0.112945676, %v2335_v40  ;;  %v2325_v46 = vadd.f32 0.05243302, %v2324_v42 }
 0xeb4   : > { %v2337_v44 = vmul.f32 %v2336_v41, %v2319_v28  ;;  %v2326_v49 = vmul.f32 %v2325_v46, %v2319_v28 }
 0xeb6   : > { %v2338_v45 = vadd.f32 0.4994258, %v2337_v44  ;;  %v2327_v50 = vadd.f32 0.18741608, %v2326_v49 }
 0xeb8   : > { %v2339_v47 = vmul.f32 %v2338_v45, %v2319_v28  ;;  %v2328_v52 = vmul.f32 %v2327_v50, %v2319_v28 }
 0xeba   : > { %v2340_v48 = vadd.f32 1.0, %v2339_v47  ;;  %v2329_v56 = vadd.f32 1.1283791, %v2328_v52 }
 0xebc   : > { %3247 = vrcp.f32 %v2340_v48  ;;  %v2352_v55 = vand.u32 2147483648, %v2340_v48  ;;  %v2350_v58 = vand.u32 2147483647, %v2340_v48  ;;  %vm2346_vm4 = vweird.f32 %v2340_v48 }
 0xebd   : > { %v2330_v62 = vmul.f32 %v2329_v56, %v2317_v25 }
 0xebe   : > { %v2353_v61 = vor.u32 1.1754944e-38, %v2352_v55  ;;  %vm2351_vm6 = vcmp.eq.f32.partialorder %v2350_v58, 8.507059e+37 }
 0xec2   : > { %v3248_v51 = vpop.eup %3247 }
 0xec3   : > { %v2342_v53 = vmul.f32 %v3248_v51, %v2340_v48  ;;  %vm2347_vm3 = vweird.f32 %v3248_v51 }
 0xec4   : > { %vm2348_vm5 = vmor %vm2346_vm4, %vm2347_vm3 }
 0xec5   : > { %v2343_v54 = vsub.f32 1.0, %v2342_v53 }
 0xec7   : > { %v2344_v57 = vmul.f32 %v3248_v51, %v2343_v54 }
 0xec9   : > { %v2345_v60 = vadd.f32 %v3248_v51, %v2344_v57 }
 0xecb   : > { %v2349_v63 = vsel %vm2348_vm5, %v3248_v51, %v2345_v60 }
 0xecc   : > { %v2354_v0 = vsel %vm2351_vm6, %v2353_v61, %v2349_v63 }
 0xecd   : > { %v2355_v2 = vmul.f32 %v2354_v0, %v2330_v62 }
 0xecf   : > { %v3005_v3 = vclamps-f32 %v2355_v2, 1.0 }
 0xed1   : > { %v2358_v5 = vadd.f32 1.0, %v3005_v3 }
 0xed3   : > { %v2359_v26 = vmul.f32 %v2358_v5, %v2316_v4 }
 0xed5   : > { %v2368_v6 = vpack.c.bf16 %v2359_v26, %v2359_v26 }
 0xed7   : > { %3022 = vmatmul.msk.bf16.vlgmr.msrb.gmra.mxu3 %vm2393_vm7, %v2368_v6 }
 0xf5a   : > { %v2406_v8 = vpop.f32.mrf.mxu3 }
 0xf5b   : > { %v2410_v10 = vadd.f32 %v2406_v8, %v4197_v59 }
 0xf5d   : > { %v2415_v11 = vadd.f32 %v3204_v7, %v2410_v10 }
 0xf5e   : > { %2420 = sbr.rel (%p3023_p11) target bundleno = 4238 (0x108e), region = 152 }
 0xf5f   : > { %2416 = vst.msk [vmem:[#allocation2] sm:$0xff] %vm1282_vm1, %v2415_v11 }
 0xf62   : > { %v2408_v12 = vpop.f32.mrf.mxu3 }
 0xf63   : > { %v2423_v13 = vsel %vm1282_vm1, %v2415_v11, 0.0  ;;  %v3249_v28 = vld [vmem:[%s4455_s20] ss:$0 sm:$0xff] }
 0xf64   : > { %2424 = vadd.xlane.f32.xlu0 %v2423_v13 }
 0xfd7   : > { %v2425_v14 = vpop.xlane.xlu0 %2424 }
 0xfd8   : > { %v2426_v15 = vmul.f32 %v2425_v14, %v4042_v9 }
 0xfda   : > { %v2427_v16 = vsub.f32 %v2415_v11, %v2426_v15 }
 0xfdc   : > { %v2428_v17 = vmul.f32 %v2427_v16, %v2427_v16 }
 0xfde   : > { %v2429_v18 = vsel %vm1282_vm1, %v2428_v17, 0.0 }
 0xfdf   : > { %2430 = vadd.xlane.f32.xlu0 %v2429_v18 }
0x1052   : > { %v2431_v19 = vpop.xlane.xlu0 %2430 }
0x1053   : > { %v2432_v59 = vmul.f32 %v2431_v19, %v4042_v9  ;;  %v3250_v9 = vld [vmem:[%s4456_s25] ss:$0 sm:$0xff] }
0x1055   : > { %v2433_v20 = vadd.f32 1e-05, %v2432_v59 }
0x1057   : > { %3251 = vrsqrt.f32 %v2433_v20  ;;  %vm2440_vm9 = vweird.f32 %v2433_v20 }
0x105d   : > { %v3252_v21 = vpop.eup %3251 }
0x105e   : > { %v2435_v22 = vmul.f32 %v3252_v21, %v2433_v20  ;;  %vm2441_vm8 = vweird.f32 %v3252_v21 }
0x105f   : > { %vm2442_vm10 = vmor %vm2440_vm9, %vm2441_vm8 }
0x1060   : > { %v2436_v23 = vmul.f32 %v3252_v21, %v2435_v22 }
0x1062   : > { %v2437_v24 = vmul.f32 0.5, %v2436_v23 }
0x1064   : > { %v2438_v25 = vsub.f32 1.5, %v2437_v24 }
0x1066   : > { %v2439_v27 = vmul.f32 %v3252_v21, %v2438_v25 }
0x1068   : > { %v2443_v29 = vsel %vm2442_vm10, %v3252_v21, %v2439_v27 }
0x1069   : > { %v2444_v30 = vmul.f32 %v2443_v29, %v2427_v16 }
0x106b   : > { %v2448_v31 = vmul.f32 %v3249_v28, %v2444_v30 }
0x106d   : > { %v2452_v32 = vadd.f32 %v3250_v9, %v2448_v31 }
0x106f   : > { %v2453_v33 = vsub.f32 0.0, %v2452_v32 }
0x1071   : > { %v2454_v34 = vmul.f32 1.442695, %v2453_v33 }
0x1073   : > { %3253 = vpow2.f32 %v2454_v34 }
0x1079   : > { %v3254_v35 = vpop.eup %3253 }
0x107a   : > { %v2456_v36 = vadd.f32 1.0, %v3254_v35 }
0x107c   : > { %3255 = vrcp.f32 %v2456_v36  ;;  %v2468_v39 = vand.u32 2147483648, %v2456_v36  ;;  %v2466_v41 = vand.u32 2147483647, %v2456_v36  ;;  %vm2462_vm12 = vweird.f32 %v2456_v36 }
0x107e   : > { %v2469_v43 = vor.u32 1.1754944e-38, %v2468_v39  ;;  %vm2467_vm14 = vcmp.eq.f32.partialorder %v2466_v41, 8.507059e+37 }
0x1082   : > { %v3256_v1 = vpop.eup %3255 }
0x1083   : > { %v2458_v37 = vmul.f32 %v3256_v1, %v2456_v36  ;;  %vm2463_vm11 = vweird.f32 %v3256_v1 }
0x1084   : > { %vm2464_vm13 = vmor %vm2462_vm12, %vm2463_vm11 }
0x1085   : > { %v2459_v38 = vsub.f32 1.0, %v2458_v37 }
0x1087   : > { %v2460_v40 = vmul.f32 %v3256_v1, %v2459_v38 }
0x1089   : > { %v2461_v42 = vadd.f32 %v3256_v1, %v2460_v40 }
0x108b   : > { %v2465_v44 = vsel %vm2464_vm13, %v3256_v1, %v2461_v42 }
0x108c   : > { %v2470_v45 = vsel %vm2467_vm14, %v2469_v43, %v2465_v44 }
0x108d   : > { %2472 = vst.msk [vmem:[%s1197_s1] sm:$0xff] %vm1282_vm1, %v2470_v45 }
0x108e PF: > { %s4457_s10 = sld [smem:[#allocation26_spill]]  ;;  %s2486_s21 = sshll.u32 %s1197_s1, 4  ;;  %s2487_s21 = int_to_ptr.vmem [resolvable:$true] %s2486_s21 }
0x108f   : > { %s4458_s29 = sld [smem:[#allocation36_spill]] }
0x1090   : > { %s4460_s16 = sld [smem:[#allocation65_spill]] }
0x1094   : > { %s3025_s15 = sshll.u32 %s4457_s10, 3 }
0x1095   : > { %s2474_s19 = scalar_lea.sflag [#allocation5], %s4458_s29 }
0x1096   : > { %s2484_s6 = scalar_lea.hbm %s4460_s16, %s3025_s15  ;;  %s3457_s23 = scalar_lea.hbm %s4460_s16, 16 }
0x1097   : > { %s2488_s13 = sshll.u32 %s2484_s6, 4  ;;  %s2489_s13 = int_to_ptr.hbm [resolvable:$true] %s2488_s13 }
0x1098   : > { %s3451_s0 = sshra.s32 %s2489_s13, 4  ;;  %s3452_s0 = int_to_ptr.hbm [resolvable:$true] %s3451_s0 }
0x1099   : > { %s3453_s28 = scalar_lea.hbm %s3452_s0, 8  ;;  %p3458_p7 = scmp.lt.s32.totalorder %s3452_s0, %s4460_s16 }
0x109a   : > { %p3454_p0 = scmp.ne.s32.totalorder %s3452_s0, %s3453_s28  ;;  %p3459_p12 = scmp.lt.s32.totalorder %s3457_s23, %s3453_s28 }
0x109c   : > { %p3455_p4 = pnand %p3454_p0, %p3783_p8  ;;  %p3460_p13 = por %p3459_p12, %p3458_p7 }
0x109e   : > { %p3456_p5 = pneg %p3455_p4 }
0x10a0   : > { %p3461_p1 = pnand %p3460_p13, %p3456_p5 }
0x10a2   : > { %3464 = shalt.err (!%p3461_p1)
}
0x10a3   : > { %3076 = dma.vmem_to_hbm [thread:$0]  (%p3783_p8), %s2487_s21, 128, %s2489_s13, %s2474_s19  }
0x10a4 PF: > { %s4461_s3 = sld [smem:[#allocation29_spill]] }
0x10a5   : > { %s4462_s1 = sld [smem:[#allocation22_spill]] }
0x10aa   : > { %p3102_p3 = scmp.ge.s32.totalorder %s4461_s3, 2 }
0x10ab   : > { %s2500_s4 = sand.u32 1, %s4462_s1  }
0x10ac   : > { %p3098_p2 = pnand %p3102_p3, %p3787_p9  ;;  %s2501_s18 = scalar_lea.sflag [#allocation5], %s2500_s4 }
0x10ae   : > { %p3099_p6 = pneg %p3098_p2 }
0x10b0   : > { %3526 = dma.done.wait (%p3099_p6), %s2501_s18, 128  }
0x10b1   : > { %3528 = vsyncadd (%p3099_p6), %s2501_s18, 4294967168  ;;  %s50_s4 = sadd.s32 1, %s4461_s3   ;;  %s4464_s29 = sld [smem:[#allocation20_spill]] }
0x10b2   : > { %p47_p10 = scmp.ge.s32.totalorder %s50_s4, 6   ;;  %s4465_s2 = sld [smem:[#allocation21_spill]] }
0x10b3   : > { %s4466_s6 = sld [smem:[#allocation34_spill]] }
0x10b4   : > { %s4467_s30 = sld [smem:[#allocation23_spill]] }
0x10b5   : > { %s4468_s7 = sld [smem:[#allocation24_spill]] }
0x10b6   : > { %s4469_s3 = sld [smem:[#allocation35_spill]]  ;;  %49 = sbr.rel (!%p47_p10) target bundleno = 42 (0x2a), region = 285 }
0x10b7   : > { %s4470_s26 = sld [smem:[#allocation27_spill]] }
0x10b8   : > { %s4471_s1 = sld [smem:[#allocation28_spill]] }
0x10b9   : > { %s4472_s8 = sld [smem:[#allocation32_spill]] }
0x10ba   : > { %s4473_s27 = sld [smem:[#allocation33_spill]] }
0x10bb   :  { %2507 = vsyncpa [#allocation4], 1 }
0x10bc   :  { %2509 = vsyncpa [#allocation4 + $0x1], 1 }
0x10bd   :  { %2510 = vsyncpa [#allocation7], 1 }
0x10be   :  { %2512 = vsyncpa [#allocation7 + $0x1], 1 }
0x10bf   :  { %2513 = vsyncpa [#allocation10], 1 }
0x10c0   :  { %2515 = vsyncpa [#allocation10 + $0x1], 1 }
0x10c1   :  { %2516 = vsyncpa [#allocation13], 1 }
0x10c2   :  { %2518 = vsyncpa [#allocation13 + $0x1], 1 }
0x10c3   :  { %2519 = vsyncpa [#allocation5], 1 }
0x10c4   :  { %2521 = vsyncpa [#allocation5 + $0x1], 1 }

</bundles_post_ra>
